<compile_context>
chip_gen: v7x
topology: tpu7x:2x2x1
jax: 0.10.0
libtpu: 0.0.40
codegen_flags: <defaults>
</compile_context>

<pallas_src>
import functools
import math

import jax
import jax.numpy as jnp
from jax.experimental import pallas as pl
from jax.experimental.pallas import tpu as pltpu


# ----------------------------- Pallas kernel ------------------------------- #

def _full_spec(shape):
    # single grid step, whole array resident in VMEM
    return pl.BlockSpec(shape, lambda i: (0,) * len(shape))


def _dgi_fused_kernel(x_ref, perm_ref, w0_ref, a0_ref, w1_ref, a1_ref,
                      wb_ref, b_ref, h1_ref, logits_ref, *, num_heads, head_dim):
    """Fused DGI forward.

    x:    [N, Fin]            node features
    perm: [N, 1] int32        corruption permutation (x_corrupt[i] = x[perm[i]])
    w0:   [Fin, H*Fh]         layer-0 fc weights, all heads concatenated
    a0:   [H*Fh, 2H]          layer-0 attn vectors, block-diagonal (src | dst)
    w1:   [H*Fh, Fout]        layer-1 fc weight (single head)
    a1:   [Fout, 2]           layer-1 attn vectors (col 0 = src, col 1 = dst)
    wb:   [Fout, Fout]        nn.Bilinear weight[0]
    b:    [1, 1] (SMEM)       nn.Bilinear bias
    outputs: h1 [N, Fout], logits [1, 2N]
    """
    n = x_ref.shape[0]
    x = x_ref[...]

    # ---- corrupted features: in-kernel row gather via exact one-hot matmul ----
    col = jax.lax.broadcasted_iota(jnp.int32, (n, n), 1)
    onehot = (perm_ref[...] == col).astype(jnp.float32)              # [N, N]
    x_corrupt = jnp.dot(onehot, x, preferred_element_type=jnp.float32)

    # weights loaded once, shared by both passes; bf16 operands for the MXU
    w0 = w0_ref[...].astype(jnp.bfloat16)
    a0 = a0_ref[...].astype(jnp.bfloat16)
    w1 = w1_ref[...].astype(jnp.bfloat16)
    a1 = a1_ref[...].astype(jnp.bfloat16)

    def attention(z, s_src, s_dst):
        # z: [N, F] f32; s_src/s_dst: [N, 1] f32
        # e[dst, src] = leaky_relu(a_src . z_src + a_dst . z_dst), slope 0.01
        e = s_dst + s_src.T                                          # [N, N]
        e = jnp.where(e > 0, e, 0.01 * e)
        # softmax over incoming edges (src axis) per destination node (f32)
        m = jnp.max(e, axis=1, keepdims=True)
        p = jnp.exp(e - m)
        alpha = p / jnp.sum(p, axis=1, keepdims=True)
        # h[dst] = sum_src alpha[dst, src] * z[src]
        return jnp.dot(alpha.astype(jnp.bfloat16), z.astype(jnp.bfloat16),
                       preferred_element_type=jnp.float32)

    def gat(h0):
        # layer 0: all heads batched into one matmul; one 2H-lane score matmul
        z_all = jnp.dot(h0.astype(jnp.bfloat16), w0,
                        preferred_element_type=jnp.float32)          # [N, H*Fh]
        s_all = jnp.dot(z_all.astype(jnp.bfloat16), a0,
                        preferred_element_type=jnp.float32)          # [N, 2H]
        heads = []
        for h in range(num_heads):
            z_h = z_all[:, h * head_dim:(h + 1) * head_dim]
            heads.append(attention(z_h,
                                   s_all[:, h:h + 1],
                                   s_all[:, num_heads + h:num_heads + h + 1]))
        hcat = jnp.concatenate(heads, axis=1)                        # [N, H*Fh]
        hcat = jnp.where(hcat > 0, hcat, jnp.exp(hcat) - 1.0)        # ELU
        # TODO(synk): training-mode stochastic dropout not implemented (eval identity).
        # layer 1: single head -> out_dim (last layer: no activation)
        z1 = jnp.dot(hcat.astype(jnp.bfloat16), w1,
                     preferred_element_type=jnp.float32)             # [N, Fout]
        s1 = jnp.dot(z1.astype(jnp.bfloat16), a1,
                     preferred_element_type=jnp.float32)             # [N, 2]
        return attention(z1, s1[:, 0:1], s1[:, 1:2])

    h1 = gat(x)                                                      # positive
    h2 = gat(x_corrupt)                                              # corrupted

    # ---- discriminator: AvgReadout + Sigmoid + Bilinear -----------------------
    c = jnp.mean(h1, axis=0, keepdims=True)                          # [1, Fout]
    c = 1.0 / (1.0 + jnp.exp(-c))                                    # sigmoid
    h_both = jnp.concatenate([h1, h2], axis=0)                       # [2N, Fout]
    t = jnp.dot(h_both.astype(jnp.bfloat16), wb_ref[...].astype(jnp.bfloat16),
                preferred_element_type=jnp.float32)                  # [2N, Fout]
    # sc[n] = h[n] @ Wb @ c + b  (row-sum against broadcast c avoids transposes)
    sc = jnp.sum(t * c, axis=1, keepdims=True) + b_ref[0, 0]         # [2N, 1]

    h1_ref[...] = h1
    logits_ref[...] = sc.T                                           # [1, 2N]


def dgi_forward(x, perm, params, *, num_heads, hidden_dim):
    n = x.shape[0]
    out_dim = params["w1"].shape[1]
    kernel = functools.partial(_dgi_fused_kernel,
                               num_heads=num_heads, head_dim=hidden_dim)
    h1, logits = pl.pallas_call(
        kernel,
        grid=(1,),
        in_specs=[
            _full_spec(x.shape),
            _full_spec((n, 1)),
            _full_spec(params["w0"].shape),
            _full_spec(params["a0"].shape),
            _full_spec(params["w1"].shape),
            _full_spec(params["a1"].shape),
            _full_spec(params["wb"].shape),
            pl.BlockSpec(memory_space=pltpu.MemorySpace.SMEM),       # scalar bias
        ],
        out_specs=[_full_spec((n, out_dim)), _full_spec((1, 2 * n))],
        out_shape=[jax.ShapeDtypeStruct((n, out_dim), jnp.float32),
                   jax.ShapeDtypeStruct((1, 2 * n), jnp.float32)],
        compiler_params=pltpu.CompilerParams(dimension_semantics=("arbitrary",)),
    )(x, perm.reshape(n, 1).astype(jnp.int32),
      params["w0"], params["a0"], params["w1"], params["a1"],
      params["wb"], params["b"])
    return h1, logits.reshape(-1)     # torch.cat((sc_1, sc_2), 0) -> [2N]


# ------------------------------ parameters ---------------------------------- #

def xavier_normal(key, shape, gain):
    fan_in, fan_out = shape
    std = gain * math.sqrt(2.0 / (fan_in + fan_out))
    return std * jax.random.normal(key, shape, jnp.float32)


def init_params(key, in_dim, hidden_dim, out_dim, num_heads):
    gain = math.sqrt(2.0)  # calculate_gain('relu')
    keys = jax.random.split(key, 2 * num_heads + 3)

    # layer 0: per-head fc weights concatenated -> one [Fin, H*Fh] matmul
    w0 = jnp.concatenate(
        [xavier_normal(keys[2 * h], (in_dim, hidden_dim), gain)
         for h in range(num_heads)], axis=1)

    # per-head attn vectors packed block-diagonally -> one [H*Fh, 2H] matmul
    # column h        = a_src for head h (nonzero only in that head's rows)
    # column H + h    = a_dst for head h
    a0 = jnp.zeros((num_heads * hidden_dim, 2 * num_heads), jnp.float32)
    for h in range(num_heads):
        a = xavier_normal(keys[2 * h + 1], (2 * hidden_dim, 1), gain)
        a0 = a0.at[h * hidden_dim:(h + 1) * hidden_dim, h].set(a[:hidden_dim, 0])
        a0 = a0.at[h * hidden_dim:(h + 1) * hidden_dim, num_heads + h].set(a[hidden_dim:, 0])

    # layer 1 (single head, hidden*heads -> out_dim)
    w1 = xavier_normal(keys[2 * num_heads], (num_heads * hidden_dim, out_dim), gain)
    a1_full = xavier_normal(keys[2 * num_heads + 1], (2 * out_dim, 1), gain)
    a1 = jnp.concatenate([a1_full[:out_dim], a1_full[out_dim:]], axis=1)   # [Fout, 2]

    # Discriminator: nn.Bilinear(out_dim, out_dim, 1), xavier_uniform weight, bias=0
    bound = math.sqrt(6.0 / (out_dim + out_dim))
    wb = jax.random.uniform(keys[2 * num_heads + 2], (out_dim, out_dim),
                            jnp.float32, minval=-bound, maxval=bound)
    b = jnp.zeros((1, 1), jnp.float32)
    return dict(w0=w0, a0=a0, w1=w1, a1=a1, wb=wb, b=b)


# --------------------------------- main -------------------------------------- #

if __name__ == "__main__":
    N, in_dim, hidden_dim, num_heads, out_dim = 8, 16, 8, 4, 32

    key = jax.random.PRNGKey(0)
    k_x, k_perm, k_param = jax.random.split(key, 3)

    x = jax.random.normal(k_x, (N, in_dim), jnp.float32)     # node features
    perm = jax.random.permutation(k_perm, N)                 # deterministic corruption
    params = init_params(k_param, in_dim, hidden_dim, out_dim, num_heads)

    h_1, logits = dgi_forward(x, perm, params, num_heads=num_heads,
                              hidden_dim=hidden_dim)
    jax.block_until_ready((h_1, logits))

    assert h_1.shape == (N, out_dim)
    assert logits.shape == (2 * N,)
    assert bool(jnp.all(jnp.isfinite(h_1))) and bool(jnp.all(jnp.isfinite(logits)))
    print("KERNEL_OK")
</pallas_src>

<mosaic_0001>
module attributes {stable_mosaic.version = 11 : i64} {
  func.func @_dgi_fused_kernel(%arg0: i32, %arg1: memref<8x16xf32, #tpu.memory_space<vmem>>, %arg2: memref<8x1xi32, #tpu.memory_space<vmem>>, %arg3: memref<16x32xf32, #tpu.memory_space<vmem>>, %arg4: memref<32x8xf32, #tpu.memory_space<vmem>>, %arg5: memref<32x32xf32, #tpu.memory_space<vmem>>, %arg6: memref<32x2xf32, #tpu.memory_space<vmem>>, %arg7: memref<32x32xf32, #tpu.memory_space<vmem>>, %arg8: memref<1x1xf32, #tpu.memory_space<smem>>, %arg9: memref<8x32xf32, #tpu.memory_space<vmem>>, %arg10: memref<1x16xf32, #tpu.memory_space<vmem>>) attributes {dimension_semantics = [#tpu.dimension_semantics<arbitrary>], iteration_bounds = array<i64: 1>, scalar_prefetch = 0 : i64, scratch_operands = 0 : i64, tpu.core_type = #tpu.core_type<tc>, window_params = [{pipeline_mode = #tpu.pipeline_mode<synchronous>, transform_indices = @transform_0, window_bounds = array<i64: 8, 16>}, {pipeline_mode = #tpu.pipeline_mode<synchronous>, transform_indices = @transform_1, window_bounds = array<i64: 8, 1>}, {pipeline_mode = #tpu.pipeline_mode<synchronous>, transform_indices = @transform_2, window_bounds = array<i64: 16, 32>}, {pipeline_mode = #tpu.pipeline_mode<synchronous>, transform_indices = @transform_3, window_bounds = array<i64: 32, 8>}, {pipeline_mode = #tpu.pipeline_mode<synchronous>, transform_indices = @transform_4, window_bounds = array<i64: 32, 32>}, {pipeline_mode = #tpu.pipeline_mode<synchronous>, transform_indices = @transform_5, window_bounds = array<i64: 32, 2>}, {pipeline_mode = #tpu.pipeline_mode<synchronous>, transform_indices = @transform_6, window_bounds = array<i64: 32, 32>}, {transform_indices = @transform_7, window_bounds = array<i64: 1, 1>}, {pipeline_mode = #tpu.pipeline_mode<synchronous>, transform_indices = @transform_8, window_bounds = array<i64: 8, 32>}, {pipeline_mode = #tpu.pipeline_mode<synchronous>, transform_indices = @transform_9, window_bounds = array<i64: 1, 16>}]} {
    %c0 = arith.constant 0 : index
    %c0_0 = arith.constant 0 : index
    %0 = vector.load %arg1[%c0, %c0_0] : memref<8x16xf32, #tpu.memory_space<vmem>>, vector<8x16xf32>
    %1 = tpu.iota {dimensions = array<i32: 1>} : vector<8x8xi32>
    %c0_1 = arith.constant 0 : index
    %c0_2 = arith.constant 0 : index
    %2 = vector.load %arg2[%c0_1, %c0_2] : memref<8x1xi32, #tpu.memory_space<vmem>>, vector<8x1xi32>
    %3 = vector.broadcast %2 : vector<8x1xi32> to vector<8x8xi32>
    %4 = arith.cmpi eq, %3, %1 : vector<8x8xi32>
    %5 = arith.extui %4 : vector<8x8xi1> to vector<8x8xi32>
    %6 = arith.sitofp %5 : vector<8x8xi32> to vector<8x8xf32>
    %cst = arith.constant dense<0.000000e+00> : vector<8x16xf32>
    %7 = tpu.matmul %6, %0, %cst {dimension_numbers = #tpu.dot_dimension_numbers<[1], [0], [0], [1], [0, 0, 1, 1], [], []>} : vector<8x8xf32>, vector<8x16xf32>, vector<8x16xf32> -> vector<8x16xf32>
    %c0_3 = arith.constant 0 : index
    %c0_4 = arith.constant 0 : index
    %8 = vector.load %arg3[%c0_3, %c0_4] : memref<16x32xf32, #tpu.memory_space<vmem>>, vector<16x32xf32>
    %9 = arith.truncf %8 : vector<16x32xf32> to vector<16x32xbf16>
    %c0_5 = arith.constant 0 : index
    %c0_6 = arith.constant 0 : index
    %10 = vector.load %arg4[%c0_5, %c0_6] : memref<32x8xf32, #tpu.memory_space<vmem>>, vector<32x8xf32>
    %11 = arith.truncf %10 : vector<32x8xf32> to vector<32x8xbf16>
    %c0_7 = arith.constant 0 : index
    %c0_8 = arith.constant 0 : index
    %12 = vector.load %arg5[%c0_7, %c0_8] : memref<32x32xf32, #tpu.memory_space<vmem>>, vector<32x32xf32>
    %13 = arith.truncf %12 : vector<32x32xf32> to vector<32x32xbf16>
    %c0_9 = arith.constant 0 : index
    %c0_10 = arith.constant 0 : index
    %14 = vector.load %arg6[%c0_9, %c0_10] : memref<32x2xf32, #tpu.memory_space<vmem>>, vector<32x2xf32>
    %15 = arith.truncf %14 : vector<32x2xf32> to vector<32x2xbf16>
    %16 = arith.truncf %0 : vector<8x16xf32> to vector<8x16xbf16>
    %cst_11 = arith.constant dense<0.000000e+00> : vector<8x32xf32>
    %17 = tpu.matmul %16, %9, %cst_11 {dimension_numbers = #tpu.dot_dimension_numbers<[1], [0], [0], [1], [0, 0, 1, 1], [], []>} : vector<8x16xbf16>, vector<16x32xbf16>, vector<8x32xf32> -> vector<8x32xf32>
    %18 = arith.truncf %17 : vector<8x32xf32> to vector<8x32xbf16>
    %cst_12 = arith.constant dense<0.000000e+00> : vector<8x8xf32>
    %19 = tpu.matmul %18, %11, %cst_12 {dimension_numbers = #tpu.dot_dimension_numbers<[1], [0], [0], [1], [0, 0, 1, 1], [], []>} : vector<8x32xbf16>, vector<32x8xbf16>, vector<8x8xf32> -> vector<8x8xf32>
    %20 = vector.extract_strided_slice %17 {offsets = [0, 0], sizes = [8, 8], strides = [1, 1]} : vector<8x32xf32> to vector<8x8xf32>
    %21 = vector.extract_strided_slice %19 {offsets = [0, 0], sizes = [8, 1], strides = [1, 1]} : vector<8x8xf32> to vector<8x1xf32>
    %22 = vector.extract_strided_slice %19 {offsets = [0, 4], sizes = [8, 1], strides = [1, 1]} : vector<8x8xf32> to vector<8x1xf32>
    %23 = tpu.transpose %21, [1, 0] : vector<8x1xf32> -> vector<1x8xf32>
    %24 = vector.broadcast %22 : vector<8x1xf32> to vector<8x8xf32>
    %25 = vector.broadcast %23 : vector<1x8xf32> to vector<8x8xf32>
    %26 = arith.addf %24, %25 : vector<8x8xf32>
    %cst_13 = arith.constant 0.000000e+00 : f32
    %27 = vector.broadcast %cst_13 : f32 to vector<8x8xf32>
    %28 = arith.cmpf ogt, %26, %27 : vector<8x8xf32>
    %cst_14 = arith.constant 0.00999999977 : f32
    %29 = vector.broadcast %cst_14 : f32 to vector<8x8xf32>
    %30 = arith.mulf %29, %26 : vector<8x8xf32>
    %31 = arith.select %28, %26, %30 : vector<8x8xi1>, vector<8x8xf32>
    %cst_15 = arith.constant dense<0xFF800000> : vector<8xf32>
    %32 = vector.multi_reduction <maximumf>, %31, %cst_15 [1] : vector<8x8xf32> to vector<8xf32>
    %33 = vector.shape_cast %32 : vector<8xf32> to vector<8x1xf32>
    %34 = vector.broadcast %33 : vector<8x1xf32> to vector<8x8xf32>
    %35 = arith.subf %31, %34 : vector<8x8xf32>
    %36 = math.exp %35 : vector<8x8xf32>
    %cst_16 = arith.constant dense<0.000000e+00> : vector<8xf32>
    %37 = vector.multi_reduction <add>, %36, %cst_16 [1] : vector<8x8xf32> to vector<8xf32>
    %38 = vector.shape_cast %37 : vector<8xf32> to vector<8x1xf32>
    %39 = vector.broadcast %38 : vector<8x1xf32> to vector<8x8xf32>
    %40 = arith.divf %36, %39 : vector<8x8xf32>
    %41 = arith.truncf %40 : vector<8x8xf32> to vector<8x8xbf16>
    %42 = arith.truncf %20 : vector<8x8xf32> to vector<8x8xbf16>
    %cst_17 = arith.constant dense<0.000000e+00> : vector<8x8xf32>
    %43 = tpu.matmul %41, %42, %cst_17 {dimension_numbers = #tpu.dot_dimension_numbers<[1], [0], [0], [1], [0, 0, 1, 1], [], []>} : vector<8x8xbf16>, vector<8x8xbf16>, vector<8x8xf32> -> vector<8x8xf32>
    %44 = vector.extract_strided_slice %17 {offsets = [0, 8], sizes = [8, 8], strides = [1, 1]} : vector<8x32xf32> to vector<8x8xf32>
    %45 = vector.extract_strided_slice %19 {offsets = [0, 1], sizes = [8, 1], strides = [1, 1]} : vector<8x8xf32> to vector<8x1xf32>
    %46 = vector.extract_strided_slice %19 {offsets = [0, 5], sizes = [8, 1], strides = [1, 1]} : vector<8x8xf32> to vector<8x1xf32>
    %47 = tpu.transpose %45, [1, 0] : vector<8x1xf32> -> vector<1x8xf32>
    %48 = vector.broadcast %46 : vector<8x1xf32> to vector<8x8xf32>
    %49 = vector.broadcast %47 : vector<1x8xf32> to vector<8x8xf32>
    %50 = arith.addf %48, %49 : vector<8x8xf32>
    %cst_18 = arith.constant 0.000000e+00 : f32
    %51 = vector.broadcast %cst_18 : f32 to vector<8x8xf32>
    %52 = arith.cmpf ogt, %50, %51 : vector<8x8xf32>
    %cst_19 = arith.constant 0.00999999977 : f32
    %53 = vector.broadcast %cst_19 : f32 to vector<8x8xf32>
    %54 = arith.mulf %53, %50 : vector<8x8xf32>
    %55 = arith.select %52, %50, %54 : vector<8x8xi1>, vector<8x8xf32>
    %cst_20 = arith.constant dense<0xFF800000> : vector<8xf32>
    %56 = vector.multi_reduction <maximumf>, %55, %cst_20 [1] : vector<8x8xf32> to vector<8xf32>
    %57 = vector.shape_cast %56 : vector<8xf32> to vector<8x1xf32>
    %58 = vector.broadcast %57 : vector<8x1xf32> to vector<8x8xf32>
    %59 = arith.subf %55, %58 : vector<8x8xf32>
    %60 = math.exp %59 : vector<8x8xf32>
    %cst_21 = arith.constant dense<0.000000e+00> : vector<8xf32>
    %61 = vector.multi_reduction <add>, %60, %cst_21 [1] : vector<8x8xf32> to vector<8xf32>
    %62 = vector.shape_cast %61 : vector<8xf32> to vector<8x1xf32>
    %63 = vector.broadcast %62 : vector<8x1xf32> to vector<8x8xf32>
    %64 = arith.divf %60, %63 : vector<8x8xf32>
    %65 = arith.truncf %64 : vector<8x8xf32> to vector<8x8xbf16>
    %66 = arith.truncf %44 : vector<8x8xf32> to vector<8x8xbf16>
    %cst_22 = arith.constant dense<0.000000e+00> : vector<8x8xf32>
    %67 = tpu.matmul %65, %66, %cst_22 {dimension_numbers = #tpu.dot_dimension_numbers<[1], [0], [0], [1], [0, 0, 1, 1], [], []>} : vector<8x8xbf16>, vector<8x8xbf16>, vector<8x8xf32> -> vector<8x8xf32>
    %68 = vector.extract_strided_slice %17 {offsets = [0, 16], sizes = [8, 8], strides = [1, 1]} : vector<8x32xf32> to vector<8x8xf32>
    %69 = vector.extract_strided_slice %19 {offsets = [0, 2], sizes = [8, 1], strides = [1, 1]} : vector<8x8xf32> to vector<8x1xf32>
    %70 = vector.extract_strided_slice %19 {offsets = [0, 6], sizes = [8, 1], strides = [1, 1]} : vector<8x8xf32> to vector<8x1xf32>
    %71 = tpu.transpose %69, [1, 0] : vector<8x1xf32> -> vector<1x8xf32>
    %72 = vector.broadcast %70 : vector<8x1xf32> to vector<8x8xf32>
    %73 = vector.broadcast %71 : vector<1x8xf32> to vector<8x8xf32>
    %74 = arith.addf %72, %73 : vector<8x8xf32>
    %cst_23 = arith.constant 0.000000e+00 : f32
    %75 = vector.broadcast %cst_23 : f32 to vector<8x8xf32>
    %76 = arith.cmpf ogt, %74, %75 : vector<8x8xf32>
    %cst_24 = arith.constant 0.00999999977 : f32
    %77 = vector.broadcast %cst_24 : f32 to vector<8x8xf32>
    %78 = arith.mulf %77, %74 : vector<8x8xf32>
    %79 = arith.select %76, %74, %78 : vector<8x8xi1>, vector<8x8xf32>
    %cst_25 = arith.constant dense<0xFF800000> : vector<8xf32>
    %80 = vector.multi_reduction <maximumf>, %79, %cst_25 [1] : vector<8x8xf32> to vector<8xf32>
    %81 = vector.shape_cast %80 : vector<8xf32> to vector<8x1xf32>
    %82 = vector.broadcast %81 : vector<8x1xf32> to vector<8x8xf32>
    %83 = arith.subf %79, %82 : vector<8x8xf32>
    %84 = math.exp %83 : vector<8x8xf32>
    %cst_26 = arith.constant dense<0.000000e+00> : vector<8xf32>
    %85 = vector.multi_reduction <add>, %84, %cst_26 [1] : vector<8x8xf32> to vector<8xf32>
    %86 = vector.shape_cast %85 : vector<8xf32> to vector<8x1xf32>
    %87 = vector.broadcast %86 : vector<8x1xf32> to vector<8x8xf32>
    %88 = arith.divf %84, %87 : vector<8x8xf32>
    %89 = arith.truncf %88 : vector<8x8xf32> to vector<8x8xbf16>
    %90 = arith.truncf %68 : vector<8x8xf32> to vector<8x8xbf16>
    %cst_27 = arith.constant dense<0.000000e+00> : vector<8x8xf32>
    %91 = tpu.matmul %89, %90, %cst_27 {dimension_numbers = #tpu.dot_dimension_numbers<[1], [0], [0], [1], [0, 0, 1, 1], [], []>} : vector<8x8xbf16>, vector<8x8xbf16>, vector<8x8xf32> -> vector<8x8xf32>
    %92 = vector.extract_strided_slice %17 {offsets = [0, 24], sizes = [8, 8], strides = [1, 1]} : vector<8x32xf32> to vector<8x8xf32>
    %93 = vector.extract_strided_slice %19 {offsets = [0, 3], sizes = [8, 1], strides = [1, 1]} : vector<8x8xf32> to vector<8x1xf32>
    %94 = vector.extract_strided_slice %19 {offsets = [0, 7], sizes = [8, 1], strides = [1, 1]} : vector<8x8xf32> to vector<8x1xf32>
    %95 = tpu.transpose %93, [1, 0] : vector<8x1xf32> -> vector<1x8xf32>
    %96 = vector.broadcast %94 : vector<8x1xf32> to vector<8x8xf32>
    %97 = vector.broadcast %95 : vector<1x8xf32> to vector<8x8xf32>
    %98 = arith.addf %96, %97 : vector<8x8xf32>
    %cst_28 = arith.constant 0.000000e+00 : f32
    %99 = vector.broadcast %cst_28 : f32 to vector<8x8xf32>
    %100 = arith.cmpf ogt, %98, %99 : vector<8x8xf32>
    %cst_29 = arith.constant 0.00999999977 : f32
    %101 = vector.broadcast %cst_29 : f32 to vector<8x8xf32>
    %102 = arith.mulf %101, %98 : vector<8x8xf32>
    %103 = arith.select %100, %98, %102 : vector<8x8xi1>, vector<8x8xf32>
    %cst_30 = arith.constant dense<0xFF800000> : vector<8xf32>
    %104 = vector.multi_reduction <maximumf>, %103, %cst_30 [1] : vector<8x8xf32> to vector<8xf32>
    %105 = vector.shape_cast %104 : vector<8xf32> to vector<8x1xf32>
    %106 = vector.broadcast %105 : vector<8x1xf32> to vector<8x8xf32>
    %107 = arith.subf %103, %106 : vector<8x8xf32>
    %108 = math.exp %107 : vector<8x8xf32>
    %cst_31 = arith.constant dense<0.000000e+00> : vector<8xf32>
    %109 = vector.multi_reduction <add>, %108, %cst_31 [1] : vector<8x8xf32> to vector<8xf32>
    %110 = vector.shape_cast %109 : vector<8xf32> to vector<8x1xf32>
    %111 = vector.broadcast %110 : vector<8x1xf32> to vector<8x8xf32>
    %112 = arith.divf %108, %111 : vector<8x8xf32>
    %113 = arith.truncf %112 : vector<8x8xf32> to vector<8x8xbf16>
    %114 = arith.truncf %92 : vector<8x8xf32> to vector<8x8xbf16>
    %cst_32 = arith.constant dense<0.000000e+00> : vector<8x8xf32>
    %115 = tpu.matmul %113, %114, %cst_32 {dimension_numbers = #tpu.dot_dimension_numbers<[1], [0], [0], [1], [0, 0, 1, 1], [], []>} : vector<8x8xbf16>, vector<8x8xbf16>, vector<8x8xf32> -> vector<8x8xf32>
    %116 = tpu.concatenate %43, %67, %91, %115 in 1 : vector<8x8xf32>, vector<8x8xf32>, vector<8x8xf32>, vector<8x8xf32> -> vector<8x32xf32>
    %cst_33 = arith.constant 0.000000e+00 : f32
    %117 = vector.broadcast %cst_33 : f32 to vector<8x32xf32>
    %118 = arith.cmpf ogt, %116, %117 : vector<8x32xf32>
    %119 = math.exp %116 : vector<8x32xf32>
    %cst_34 = arith.constant 1.000000e+00 : f32
    %120 = vector.broadcast %cst_34 : f32 to vector<8x32xf32>
    %121 = arith.subf %119, %120 : vector<8x32xf32>
    %122 = arith.select %118, %116, %121 : vector<8x32xi1>, vector<8x32xf32>
    %123 = arith.truncf %122 : vector<8x32xf32> to vector<8x32xbf16>
    %cst_35 = arith.constant dense<0.000000e+00> : vector<8x32xf32>
    %124 = tpu.matmul %123, %13, %cst_35 {dimension_numbers = #tpu.dot_dimension_numbers<[1], [0], [0], [1], [0, 0, 1, 1], [], []>} : vector<8x32xbf16>, vector<32x32xbf16>, vector<8x32xf32> -> vector<8x32xf32>
    %125 = arith.truncf %124 : vector<8x32xf32> to vector<8x32xbf16>
    %cst_36 = arith.constant dense<0.000000e+00> : vector<8x2xf32>
    %126 = tpu.matmul %125, %15, %cst_36 {dimension_numbers = #tpu.dot_dimension_numbers<[1], [0], [0], [1], [0, 0, 1, 1], [], []>} : vector<8x32xbf16>, vector<32x2xbf16>, vector<8x2xf32> -> vector<8x2xf32>
    %127 = vector.extract_strided_slice %126 {offsets = [0, 0], sizes = [8, 1], strides = [1, 1]} : vector<8x2xf32> to vector<8x1xf32>
    %128 = vector.extract_strided_slice %126 {offsets = [0, 1], sizes = [8, 1], strides = [1, 1]} : vector<8x2xf32> to vector<8x1xf32>
    %129 = tpu.transpose %127, [1, 0] : vector<8x1xf32> -> vector<1x8xf32>
    %130 = vector.broadcast %128 : vector<8x1xf32> to vector<8x8xf32>
    %131 = vector.broadcast %129 : vector<1x8xf32> to vector<8x8xf32>
    %132 = arith.addf %130, %131 : vector<8x8xf32>
    %cst_37 = arith.constant 0.000000e+00 : f32
    %133 = vector.broadcast %cst_37 : f32 to vector<8x8xf32>
    %134 = arith.cmpf ogt, %132, %133 : vector<8x8xf32>
    %cst_38 = arith.constant 0.00999999977 : f32
    %135 = vector.broadcast %cst_38 : f32 to vector<8x8xf32>
    %136 = arith.mulf %135, %132 : vector<8x8xf32>
    %137 = arith.select %134, %132, %136 : vector<8x8xi1>, vector<8x8xf32>
    %cst_39 = arith.constant dense<0xFF800000> : vector<8xf32>
    %138 = vector.multi_reduction <maximumf>, %137, %cst_39 [1] : vector<8x8xf32> to vector<8xf32>
    %139 = vector.shape_cast %138 : vector<8xf32> to vector<8x1xf32>
    %140 = vector.broadcast %139 : vector<8x1xf32> to vector<8x8xf32>
    %141 = arith.subf %137, %140 : vector<8x8xf32>
    %142 = math.exp %141 : vector<8x8xf32>
    %cst_40 = arith.constant dense<0.000000e+00> : vector<8xf32>
    %143 = vector.multi_reduction <add>, %142, %cst_40 [1] : vector<8x8xf32> to vector<8xf32>
    %144 = vector.shape_cast %143 : vector<8xf32> to vector<8x1xf32>
    %145 = vector.broadcast %144 : vector<8x1xf32> to vector<8x8xf32>
    %146 = arith.divf %142, %145 : vector<8x8xf32>
    %147 = arith.truncf %146 : vector<8x8xf32> to vector<8x8xbf16>
    %148 = arith.truncf %124 : vector<8x32xf32> to vector<8x32xbf16>
    %cst_41 = arith.constant dense<0.000000e+00> : vector<8x32xf32>
    %149 = tpu.matmul %147, %148, %cst_41 {dimension_numbers = #tpu.dot_dimension_numbers<[1], [0], [0], [1], [0, 0, 1, 1], [], []>} : vector<8x8xbf16>, vector<8x32xbf16>, vector<8x32xf32> -> vector<8x32xf32>
    %150 = arith.truncf %7 : vector<8x16xf32> to vector<8x16xbf16>
    %cst_42 = arith.constant dense<0.000000e+00> : vector<8x32xf32>
    %151 = tpu.matmul %150, %9, %cst_42 {dimension_numbers = #tpu.dot_dimension_numbers<[1], [0], [0], [1], [0, 0, 1, 1], [], []>} : vector<8x16xbf16>, vector<16x32xbf16>, vector<8x32xf32> -> vector<8x32xf32>
    %152 = arith.truncf %151 : vector<8x32xf32> to vector<8x32xbf16>
    %cst_43 = arith.constant dense<0.000000e+00> : vector<8x8xf32>
    %153 = tpu.matmul %152, %11, %cst_43 {dimension_numbers = #tpu.dot_dimension_numbers<[1], [0], [0], [1], [0, 0, 1, 1], [], []>} : vector<8x32xbf16>, vector<32x8xbf16>, vector<8x8xf32> -> vector<8x8xf32>
    %154 = vector.extract_strided_slice %151 {offsets = [0, 0], sizes = [8, 8], strides = [1, 1]} : vector<8x32xf32> to vector<8x8xf32>
    %155 = vector.extract_strided_slice %153 {offsets = [0, 0], sizes = [8, 1], strides = [1, 1]} : vector<8x8xf32> to vector<8x1xf32>
    %156 = vector.extract_strided_slice %153 {offsets = [0, 4], sizes = [8, 1], strides = [1, 1]} : vector<8x8xf32> to vector<8x1xf32>
    %157 = tpu.transpose %155, [1, 0] : vector<8x1xf32> -> vector<1x8xf32>
    %158 = vector.broadcast %156 : vector<8x1xf32> to vector<8x8xf32>
    %159 = vector.broadcast %157 : vector<1x8xf32> to vector<8x8xf32>
    %160 = arith.addf %158, %159 : vector<8x8xf32>
    %cst_44 = arith.constant 0.000000e+00 : f32
    %161 = vector.broadcast %cst_44 : f32 to vector<8x8xf32>
    %162 = arith.cmpf ogt, %160, %161 : vector<8x8xf32>
    %cst_45 = arith.constant 0.00999999977 : f32
    %163 = vector.broadcast %cst_45 : f32 to vector<8x8xf32>
    %164 = arith.mulf %163, %160 : vector<8x8xf32>
    %165 = arith.select %162, %160, %164 : vector<8x8xi1>, vector<8x8xf32>
    %cst_46 = arith.constant dense<0xFF800000> : vector<8xf32>
    %166 = vector.multi_reduction <maximumf>, %165, %cst_46 [1] : vector<8x8xf32> to vector<8xf32>
    %167 = vector.shape_cast %166 : vector<8xf32> to vector<8x1xf32>
    %168 = vector.broadcast %167 : vector<8x1xf32> to vector<8x8xf32>
    %169 = arith.subf %165, %168 : vector<8x8xf32>
    %170 = math.exp %169 : vector<8x8xf32>
    %cst_47 = arith.constant dense<0.000000e+00> : vector<8xf32>
    %171 = vector.multi_reduction <add>, %170, %cst_47 [1] : vector<8x8xf32> to vector<8xf32>
    %172 = vector.shape_cast %171 : vector<8xf32> to vector<8x1xf32>
    %173 = vector.broadcast %172 : vector<8x1xf32> to vector<8x8xf32>
    %174 = arith.divf %170, %173 : vector<8x8xf32>
    %175 = arith.truncf %174 : vector<8x8xf32> to vector<8x8xbf16>
    %176 = arith.truncf %154 : vector<8x8xf32> to vector<8x8xbf16>
    %cst_48 = arith.constant dense<0.000000e+00> : vector<8x8xf32>
    %177 = tpu.matmul %175, %176, %cst_48 {dimension_numbers = #tpu.dot_dimension_numbers<[1], [0], [0], [1], [0, 0, 1, 1], [], []>} : vector<8x8xbf16>, vector<8x8xbf16>, vector<8x8xf32> -> vector<8x8xf32>
    %178 = vector.extract_strided_slice %151 {offsets = [0, 8], sizes = [8, 8], strides = [1, 1]} : vector<8x32xf32> to vector<8x8xf32>
    %179 = vector.extract_strided_slice %153 {offsets = [0, 1], sizes = [8, 1], strides = [1, 1]} : vector<8x8xf32> to vector<8x1xf32>
    %180 = vector.extract_strided_slice %153 {offsets = [0, 5], sizes = [8, 1], strides = [1, 1]} : vector<8x8xf32> to vector<8x1xf32>
    %181 = tpu.transpose %179, [1, 0] : vector<8x1xf32> -> vector<1x8xf32>
    %182 = vector.broadcast %180 : vector<8x1xf32> to vector<8x8xf32>
    %183 = vector.broadcast %181 : vector<1x8xf32> to vector<8x8xf32>
    %184 = arith.addf %182, %183 : vector<8x8xf32>
    %cst_49 = arith.constant 0.000000e+00 : f32
    %185 = vector.broadcast %cst_49 : f32 to vector<8x8xf32>
    %186 = arith.cmpf ogt, %184, %185 : vector<8x8xf32>
    %cst_50 = arith.constant 0.00999999977 : f32
    %187 = vector.broadcast %cst_50 : f32 to vector<8x8xf32>
    %188 = arith.mulf %187, %184 : vector<8x8xf32>
    %189 = arith.select %186, %184, %188 : vector<8x8xi1>, vector<8x8xf32>
    %cst_51 = arith.constant dense<0xFF800000> : vector<8xf32>
    %190 = vector.multi_reduction <maximumf>, %189, %cst_51 [1] : vector<8x8xf32> to vector<8xf32>
    %191 = vector.shape_cast %190 : vector<8xf32> to vector<8x1xf32>
    %192 = vector.broadcast %191 : vector<8x1xf32> to vector<8x8xf32>
    %193 = arith.subf %189, %192 : vector<8x8xf32>
    %194 = math.exp %193 : vector<8x8xf32>
    %cst_52 = arith.constant dense<0.000000e+00> : vector<8xf32>
    %195 = vector.multi_reduction <add>, %194, %cst_52 [1] : vector<8x8xf32> to vector<8xf32>
    %196 = vector.shape_cast %195 : vector<8xf32> to vector<8x1xf32>
    %197 = vector.broadcast %196 : vector<8x1xf32> to vector<8x8xf32>
    %198 = arith.divf %194, %197 : vector<8x8xf32>
    %199 = arith.truncf %198 : vector<8x8xf32> to vector<8x8xbf16>
    %200 = arith.truncf %178 : vector<8x8xf32> to vector<8x8xbf16>
    %cst_53 = arith.constant dense<0.000000e+00> : vector<8x8xf32>
    %201 = tpu.matmul %199, %200, %cst_53 {dimension_numbers = #tpu.dot_dimension_numbers<[1], [0], [0], [1], [0, 0, 1, 1], [], []>} : vector<8x8xbf16>, vector<8x8xbf16>, vector<8x8xf32> -> vector<8x8xf32>
    %202 = vector.extract_strided_slice %151 {offsets = [0, 16], sizes = [8, 8], strides = [1, 1]} : vector<8x32xf32> to vector<8x8xf32>
    %203 = vector.extract_strided_slice %153 {offsets = [0, 2], sizes = [8, 1], strides = [1, 1]} : vector<8x8xf32> to vector<8x1xf32>
    %204 = vector.extract_strided_slice %153 {offsets = [0, 6], sizes = [8, 1], strides = [1, 1]} : vector<8x8xf32> to vector<8x1xf32>
    %205 = tpu.transpose %203, [1, 0] : vector<8x1xf32> -> vector<1x8xf32>
    %206 = vector.broadcast %204 : vector<8x1xf32> to vector<8x8xf32>
    %207 = vector.broadcast %205 : vector<1x8xf32> to vector<8x8xf32>
    %208 = arith.addf %206, %207 : vector<8x8xf32>
    %cst_54 = arith.constant 0.000000e+00 : f32
    %209 = vector.broadcast %cst_54 : f32 to vector<8x8xf32>
    %210 = arith.cmpf ogt, %208, %209 : vector<8x8xf32>
    %cst_55 = arith.constant 0.00999999977 : f32
    %211 = vector.broadcast %cst_55 : f32 to vector<8x8xf32>
    %212 = arith.mulf %211, %208 : vector<8x8xf32>
    %213 = arith.select %210, %208, %212 : vector<8x8xi1>, vector<8x8xf32>
    %cst_56 = arith.constant dense<0xFF800000> : vector<8xf32>
    %214 = vector.multi_reduction <maximumf>, %213, %cst_56 [1] : vector<8x8xf32> to vector<8xf32>
    %215 = vector.shape_cast %214 : vector<8xf32> to vector<8x1xf32>
    %216 = vector.broadcast %215 : vector<8x1xf32> to vector<8x8xf32>
    %217 = arith.subf %213, %216 : vector<8x8xf32>
    %218 = math.exp %217 : vector<8x8xf32>
    %cst_57 = arith.constant dense<0.000000e+00> : vector<8xf32>
    %219 = vector.multi_reduction <add>, %218, %cst_57 [1] : vector<8x8xf32> to vector<8xf32>
    %220 = vector.shape_cast %219 : vector<8xf32> to vector<8x1xf32>
    %221 = vector.broadcast %220 : vector<8x1xf32> to vector<8x8xf32>
    %222 = arith.divf %218, %221 : vector<8x8xf32>
    %223 = arith.truncf %222 : vector<8x8xf32> to vector<8x8xbf16>
    %224 = arith.truncf %202 : vector<8x8xf32> to vector<8x8xbf16>
    %cst_58 = arith.constant dense<0.000000e+00> : vector<8x8xf32>
    %225 = tpu.matmul %223, %224, %cst_58 {dimension_numbers = #tpu.dot_dimension_numbers<[1], [0], [0], [1], [0, 0, 1, 1], [], []>} : vector<8x8xbf16>, vector<8x8xbf16>, vector<8x8xf32> -> vector<8x8xf32>
    %226 = vector.extract_strided_slice %151 {offsets = [0, 24], sizes = [8, 8], strides = [1, 1]} : vector<8x32xf32> to vector<8x8xf32>
    %227 = vector.extract_strided_slice %153 {offsets = [0, 3], sizes = [8, 1], strides = [1, 1]} : vector<8x8xf32> to vector<8x1xf32>
    %228 = vector.extract_strided_slice %153 {offsets = [0, 7], sizes = [8, 1], strides = [1, 1]} : vector<8x8xf32> to vector<8x1xf32>
    %229 = tpu.transpose %227, [1, 0] : vector<8x1xf32> -> vector<1x8xf32>
    %230 = vector.broadcast %228 : vector<8x1xf32> to vector<8x8xf32>
    %231 = vector.broadcast %229 : vector<1x8xf32> to vector<8x8xf32>
    %232 = arith.addf %230, %231 : vector<8x8xf32>
    %cst_59 = arith.constant 0.000000e+00 : f32
    %233 = vector.broadcast %cst_59 : f32 to vector<8x8xf32>
    %234 = arith.cmpf ogt, %232, %233 : vector<8x8xf32>
    %cst_60 = arith.constant 0.00999999977 : f32
    %235 = vector.broadcast %cst_60 : f32 to vector<8x8xf32>
    %236 = arith.mulf %235, %232 : vector<8x8xf32>
    %237 = arith.select %234, %232, %236 : vector<8x8xi1>, vector<8x8xf32>
    %cst_61 = arith.constant dense<0xFF800000> : vector<8xf32>
    %238 = vector.multi_reduction <maximumf>, %237, %cst_61 [1] : vector<8x8xf32> to vector<8xf32>
    %239 = vector.shape_cast %238 : vector<8xf32> to vector<8x1xf32>
    %240 = vector.broadcast %239 : vector<8x1xf32> to vector<8x8xf32>
    %241 = arith.subf %237, %240 : vector<8x8xf32>
    %242 = math.exp %241 : vector<8x8xf32>
    %cst_62 = arith.constant dense<0.000000e+00> : vector<8xf32>
    %243 = vector.multi_reduction <add>, %242, %cst_62 [1] : vector<8x8xf32> to vector<8xf32>
    %244 = vector.shape_cast %243 : vector<8xf32> to vector<8x1xf32>
    %245 = vector.broadcast %244 : vector<8x1xf32> to vector<8x8xf32>
    %246 = arith.divf %242, %245 : vector<8x8xf32>
    %247 = arith.truncf %246 : vector<8x8xf32> to vector<8x8xbf16>
    %248 = arith.truncf %226 : vector<8x8xf32> to vector<8x8xbf16>
    %cst_63 = arith.constant dense<0.000000e+00> : vector<8x8xf32>
    %249 = tpu.matmul %247, %248, %cst_63 {dimension_numbers = #tpu.dot_dimension_numbers<[1], [0], [0], [1], [0, 0, 1, 1], [], []>} : vector<8x8xbf16>, vector<8x8xbf16>, vector<8x8xf32> -> vector<8x8xf32>
    %250 = tpu.concatenate %177, %201, %225, %249 in 1 : vector<8x8xf32>, vector<8x8xf32>, vector<8x8xf32>, vector<8x8xf32> -> vector<8x32xf32>
    %cst_64 = arith.constant 0.000000e+00 : f32
    %251 = vector.broadcast %cst_64 : f32 to vector<8x32xf32>
    %252 = arith.cmpf ogt, %250, %251 : vector<8x32xf32>
    %253 = math.exp %250 : vector<8x32xf32>
    %cst_65 = arith.constant 1.000000e+00 : f32
    %254 = vector.broadcast %cst_65 : f32 to vector<8x32xf32>
    %255 = arith.subf %253, %254 : vector<8x32xf32>
    %256 = arith.select %252, %250, %255 : vector<8x32xi1>, vector<8x32xf32>
    %257 = arith.truncf %256 : vector<8x32xf32> to vector<8x32xbf16>
    %cst_66 = arith.constant dense<0.000000e+00> : vector<8x32xf32>
    %258 = tpu.matmul %257, %13, %cst_66 {dimension_numbers = #tpu.dot_dimension_numbers<[1], [0], [0], [1], [0, 0, 1, 1], [], []>} : vector<8x32xbf16>, vector<32x32xbf16>, vector<8x32xf32> -> vector<8x32xf32>
    %259 = arith.truncf %258 : vector<8x32xf32> to vector<8x32xbf16>
    %cst_67 = arith.constant dense<0.000000e+00> : vector<8x2xf32>
    %260 = tpu.matmul %259, %15, %cst_67 {dimension_numbers = #tpu.dot_dimension_numbers<[1], [0], [0], [1], [0, 0, 1, 1], [], []>} : vector<8x32xbf16>, vector<32x2xbf16>, vector<8x2xf32> -> vector<8x2xf32>
    %261 = vector.extract_strided_slice %260 {offsets = [0, 0], sizes = [8, 1], strides = [1, 1]} : vector<8x2xf32> to vector<8x1xf32>
    %262 = vector.extract_strided_slice %260 {offsets = [0, 1], sizes = [8, 1], strides = [1, 1]} : vector<8x2xf32> to vector<8x1xf32>
    %263 = tpu.transpose %261, [1, 0] : vector<8x1xf32> -> vector<1x8xf32>
    %264 = vector.broadcast %262 : vector<8x1xf32> to vector<8x8xf32>
    %265 = vector.broadcast %263 : vector<1x8xf32> to vector<8x8xf32>
    %266 = arith.addf %264, %265 : vector<8x8xf32>
    %cst_68 = arith.constant 0.000000e+00 : f32
    %267 = vector.broadcast %cst_68 : f32 to vector<8x8xf32>
    %268 = arith.cmpf ogt, %266, %267 : vector<8x8xf32>
    %cst_69 = arith.constant 0.00999999977 : f32
    %269 = vector.broadcast %cst_69 : f32 to vector<8x8xf32>
    %270 = arith.mulf %269, %266 : vector<8x8xf32>
    %271 = arith.select %268, %266, %270 : vector<8x8xi1>, vector<8x8xf32>
    %cst_70 = arith.constant dense<0xFF800000> : vector<8xf32>
    %272 = vector.multi_reduction <maximumf>, %271, %cst_70 [1] : vector<8x8xf32> to vector<8xf32>
    %273 = vector.shape_cast %272 : vector<8xf32> to vector<8x1xf32>
    %274 = vector.broadcast %273 : vector<8x1xf32> to vector<8x8xf32>
    %275 = arith.subf %271, %274 : vector<8x8xf32>
    %276 = math.exp %275 : vector<8x8xf32>
    %cst_71 = arith.constant dense<0.000000e+00> : vector<8xf32>
    %277 = vector.multi_reduction <add>, %276, %cst_71 [1] : vector<8x8xf32> to vector<8xf32>
    %278 = vector.shape_cast %277 : vector<8xf32> to vector<8x1xf32>
    %279 = vector.broadcast %278 : vector<8x1xf32> to vector<8x8xf32>
    %280 = arith.divf %276, %279 : vector<8x8xf32>
    %281 = arith.truncf %280 : vector<8x8xf32> to vector<8x8xbf16>
    %282 = arith.truncf %258 : vector<8x32xf32> to vector<8x32xbf16>
    %cst_72 = arith.constant dense<0.000000e+00> : vector<8x32xf32>
    %283 = tpu.matmul %281, %282, %cst_72 {dimension_numbers = #tpu.dot_dimension_numbers<[1], [0], [0], [1], [0, 0, 1, 1], [], []>} : vector<8x8xbf16>, vector<8x32xbf16>, vector<8x32xf32> -> vector<8x32xf32>
    %cst_73 = arith.constant dense<0.000000e+00> : vector<32xf32>
    %284 = vector.multi_reduction <add>, %149, %cst_73 [0] : vector<8x32xf32> to vector<32xf32>
    %285 = vector.shape_cast %284 : vector<32xf32> to vector<1x32xf32>
    %cst_74 = arith.constant 8.000000e+00 : f32
    %286 = vector.broadcast %cst_74 : f32 to vector<1x32xf32>
    %287 = arith.divf %285, %286 : vector<1x32xf32>
    %cst_75 = arith.constant 0.000000e+00 : f32
    %288 = vector.broadcast %cst_75 : f32 to vector<1x32xf32>
    %289 = arith.subf %288, %287 : vector<1x32xf32>
    %290 = math.exp %289 : vector<1x32xf32>
    %cst_76 = arith.constant 1.000000e+00 : f32
    %291 = vector.broadcast %cst_76 : f32 to vector<1x32xf32>
    %292 = arith.addf %291, %290 : vector<1x32xf32>
    %cst_77 = arith.constant 1.000000e+00 : f32
    %293 = vector.broadcast %cst_77 : f32 to vector<1x32xf32>
    %294 = arith.divf %293, %292 : vector<1x32xf32>
    %295 = tpu.concatenate %149, %283 in 0 : vector<8x32xf32>, vector<8x32xf32> -> vector<16x32xf32>
    %296 = arith.truncf %295 : vector<16x32xf32> to vector<16x32xbf16>
    %c0_78 = arith.constant 0 : index
    %c0_79 = arith.constant 0 : index
    %297 = vector.load %arg7[%c0_78, %c0_79] : memref<32x32xf32, #tpu.memory_space<vmem>>, vector<32x32xf32>
    %298 = arith.truncf %297 : vector<32x32xf32> to vector<32x32xbf16>
    %cst_80 = arith.constant dense<0.000000e+00> : vector<16x32xf32>
    %299 = tpu.matmul %296, %298, %cst_80 {dimension_numbers = #tpu.dot_dimension_numbers<[1], [0], [0], [1], [0, 0, 1, 1], [], []>} : vector<16x32xbf16>, vector<32x32xbf16>, vector<16x32xf32> -> vector<16x32xf32>
    %300 = vector.broadcast %294 : vector<1x32xf32> to vector<16x32xf32>
    %301 = arith.mulf %299, %300 : vector<16x32xf32>
    %cst_81 = arith.constant dense<0.000000e+00> : vector<16xf32>
    %302 = vector.multi_reduction <add>, %301, %cst_81 [1] : vector<16x32xf32> to vector<16xf32>
    %303 = vector.shape_cast %302 : vector<16xf32> to vector<16x1xf32>
    %c0_82 = arith.constant 0 : index
    %c0_83 = arith.constant 0 : index
    %304 = memref.load %arg8[%c0_82, %c0_83] : memref<1x1xf32, #tpu.memory_space<smem>>
    %305 = vector.broadcast %304 : f32 to vector<16x1xf32>
    %306 = arith.addf %303, %305 : vector<16x1xf32>
    %c0_84 = arith.constant 0 : index
    %c0_85 = arith.constant 0 : index
    %307 = vector.load %arg9[%c0_84, %c0_85] : memref<8x32xf32, #tpu.memory_space<vmem>>, vector<8x32xf32>
    tpu.vector_store %arg9[%c0_84, %c0_85], %149 {strides = array<i32>} : memref<8x32xf32, #tpu.memory_space<vmem>>, vector<8x32xf32>,
    %308 = tpu.transpose %306, [1, 0] : vector<16x1xf32> -> vector<1x16xf32>
    %c0_86 = arith.constant 0 : index
    %c0_87 = arith.constant 0 : index
    %309 = vector.load %arg10[%c0_86, %c0_87] : memref<1x16xf32, #tpu.memory_space<vmem>>, vector<1x16xf32>
    tpu.vector_store %arg10[%c0_86, %c0_87], %308 {strides = array<i32>} : memref<1x16xf32, #tpu.memory_space<vmem>>, vector<1x16xf32>,
    return
  }
  func.func @transform_0(%arg0: i32) -> (i32, i32) {
    %c0_i32 = arith.constant 0 : i32
    %c0_i32_0 = arith.constant 0 : i32
    %c0_i32_1 = arith.constant 0 : i32
    return %c0_i32, %c0_i32_0 : i32, i32
  }
  func.func @transform_1(%arg0: i32) -> (i32, i32) {
    %c0_i32 = arith.constant 0 : i32
    %c0_i32_0 = arith.constant 0 : i32
    %c0_i32_1 = arith.constant 0 : i32
    return %c0_i32, %c0_i32_0 : i32, i32
  }
  func.func @transform_2(%arg0: i32) -> (i32, i32) {
    %c0_i32 = arith.constant 0 : i32
    %c0_i32_0 = arith.constant 0 : i32
    %c0_i32_1 = arith.constant 0 : i32
    return %c0_i32, %c0_i32_0 : i32, i32
  }
  func.func @transform_3(%arg0: i32) -> (i32, i32) {
    %c0_i32 = arith.constant 0 : i32
    %c0_i32_0 = arith.constant 0 : i32
    %c0_i32_1 = arith.constant 0 : i32
    return %c0_i32, %c0_i32_0 : i32, i32
  }
  func.func @transform_4(%arg0: i32) -> (i32, i32) {
    %c0_i32 = arith.constant 0 : i32
    %c0_i32_0 = arith.constant 0 : i32
    %c0_i32_1 = arith.constant 0 : i32
    return %c0_i32, %c0_i32_0 : i32, i32
  }
  func.func @transform_5(%arg0: i32) -> (i32, i32) {
    %c0_i32 = arith.constant 0 : i32
    %c0_i32_0 = arith.constant 0 : i32
    %c0_i32_1 = arith.constant 0 : i32
    return %c0_i32, %c0_i32_0 : i32, i32
  }
  func.func @transform_6(%arg0: i32) -> (i32, i32) {
    %c0_i32 = arith.constant 0 : i32
    %c0_i32_0 = arith.constant 0 : i32
    %c0_i32_1 = arith.constant 0 : i32
    return %c0_i32, %c0_i32_0 : i32, i32
  }
  func.func @transform_7(%arg0: i32) -> (i32, i32) {
    %c0_i32 = arith.constant 0 : i32
    %c0_i32_0 = arith.constant 0 : i32
    %c0_i32_1 = arith.constant 0 : i32
    return %c0_i32, %c0_i32_0 : i32, i32
  }
  func.func @transform_8(%arg0: i32) -> (i32, i32) {
    %c0_i32 = arith.constant 0 : i32
    %c0_i32_0 = arith.constant 0 : i32
    %c0_i32_1 = arith.constant 0 : i32
    return %c0_i32, %c0_i32_0 : i32, i32
  }
  func.func @transform_9(%arg0: i32) -> (i32, i32) {
    %c0_i32 = arith.constant 0 : i32
    %c0_i32_0 = arith.constant 0 : i32
    %c0_i32_1 = arith.constant 0 : i32
    return %c0_i32, %c0_i32_0 : i32, i32
  }
}

</mosaic_0001>

<bundles_post_ra>
// kernel: tpu_custom_call.1
= control target key start
LH: loop header
LB: loop body
LE: loop exit
PB: predicated region body
PF: predicated region fallthrough
CT: control target
= control target key end

     0   :  { %16 = vsyncpa [#allocation4], 0  ;;  %s2481_s0 = inlined_call_operand.hbm [shape: f32[8,16], index: 0, kind: input, shape index: {}]   ;;  %s2482_s1 = inlined_call_operand.vmem [shape: s32[8,1], index: 1, kind: input, shape index: {}]   ;;  %s2483_s2 = inlined_call_operand.vmem [shape: f32[16,32], index: 2, kind: input, shape index: {}]   ;;  %s2484_s3 = inlined_call_operand.vmem [shape: f32[32,8], index: 3, kind: input, shape index: {}]   ;;  %s2485_s4 = inlined_call_operand.vmem [shape: f32[32,32], index: 4, kind: input, shape index: {}]   ;;  %s2486_s5 = inlined_call_operand.vmem [shape: f32[32,2], index: 5, kind: input, shape index: {}]   ;;  %s2487_s6 = inlined_call_operand.vmem [shape: f32[32,32], index: 6, kind: input, shape index: {}]   ;;  %s2488_s7 = inlined_call_operand.<no memory space> [shape: f32[1,1], index: 7, kind: input, shape index: {}]   ;;  %s2489_s8 = inlined_call_operand.hbm [shape: f32[8,32], index: 8, kind: output, shape index: {0}]   ;;  %s2490_s9 = inlined_call_operand.hbm [shape: f32[1,16], index: 9, kind: output, shape index: {1}]  }
   0x1   :  { %17 = vsyncpa [#allocation5], 0 }
   0x2   :  { %18 = vsyncpa [#allocation8], 0  ;;  %s2096_s30 = smov [#allocation3]   ;;  %s2024_s13 = scalar_lea.hbm %s2481_s0, 128 }
   0x3   :  { %s25_s10 = sshll.u32 %s2096_s30, 4  ;;  %p2025_p0 = scmp.ne.s32.totalorder %s2481_s0, %s2024_s13  ;;  %s26_s10 = int_to_ptr.vmem [resolvable:$true] %s25_s10 }
   0x4   :  { %p2028_p1 = scmp.lt.u32.totalorder %s2024_s13, %s2481_s0 }
   0x6   :  { %p2030_p2 = pnand %p2028_p1, %p2025_p0 }
   0x8   :  { %2033 = shalt.err (!%p2030_p2)
}
   0x9   :  { %s2034_s18 = scalar_lea.vmem %s26_s10, 128  ;;  %p2039_p4 = scmp.lt.s32.totalorder %s26_s10, %s26_s10 }
   0xa   :  { %p2035_p3 = scmp.ne.s32.totalorder %s26_s10, %s2034_s18  ;;  %p2040_p5 = scmp.lt.s32.totalorder %s2034_s18, %s2034_s18 }
   0xc   :  { %p2041_p6 = por %p2040_p5, %p2039_p4 }
   0xe   :  { %p2042_p7 = pnand %p2041_p6, %p2035_p3 }
  0x10   :  { %2045 = shalt.err (!%p2042_p7)
}
  0x11   :  { %28 = dma.hbm_to_vmem [thread:$0]  %s2481_s0, 128, %s26_s10, [#allocation4]  }
  0x12   :  { %2090 = dma.done.wait [#allocation4], 128  }
  0x13   :  { %2091 = vsyncadd [#allocation4], 4294967168  ;;  %v2097_v0 = vmov 0.0   ;;  %vm2098_vm0 = vmmov 0   ;;  %v2099_v1 = vmov 0   ;;  %v131_v2 = vld [vmem:[%s2483_s2] sm:$0xff]  ;;  %v48_v8 = vlaneseq }
  0x14   :  { %1817 = vmatprep.subr.bf16.mxu1 %v2097_v0  ;;  %1819 = vmatprep.mubr.msk.bf16.mxu1 %vm2098_vm0, %v2097_v0  ;;  %v132_v3 = vld [vmem:[%s2483_s2 + $0x8] sm:$0xff]  ;;  %v47_v4 = vld [vmem:[#allocation3] sm:$0xff]  ;;  %vm153_vm1 = vcmask 130048   ;;  %vm57_vm2 = vcmask 64512   ;;  %v136_v14 = vld [vmem:[%s2484_s3 + $0x10] sm:$0xff]  ;;  %vm198_vm4 = vcmask 261120  }
  0x15   :  { %1965 = vset.pattern.permute.xlu0 %v2099_v1  ;;  %1812 = vmatprep.subr.mxu0 %v2097_v0  ;;  %v2190_v5 = vpack.c.bf16 %v132_v3, %v131_v2  ;;  %v50_v6 = vld [vmem:[%s2482_s1] sm:$0xff]  ;;  %v152_v7 = vpack.c.bf16 %v47_v4, %v47_v4  ;;  %v49_v9 = vand.u32 127, %v48_v8  ;;  %v135_v11 = vld [vmem:[%s2484_s3 + $0x8] sm:$0xff]  ;;  %v137_v15 = vld [vmem:[%s2484_s3 + $0x18] sm:$0xff]  ;;  %vm302_vm5 = vcmask 1043456   ;;  %s2103_s11 = smov 127  }
  0x16   :  { %1814 = vmatprep.mubr.msk.f32.mxu0 %vm2098_vm0, %v2097_v0  ;;  %1813 = vmatpush3.msra.mxu0 %v47_v4  ;;  %v134_v10 = vld [vmem:[%s2484_s3] sm:$0xff]  ;;  %v2218_v17 = vpack.c.bf16 %v137_v15, %v136_v14  ;;  %v2100_v24 = vmov 4   ;;  %v2101_v25 = vmov 5   ;;  %s2102_s3 = smov 126   ;;  %s2104_s12 = smov 125   ;;  %v2105_v32 = vmov 7  }
  0x17   :  { %52 = vperm.xlu0 %1965, %v50_v6   ;;  %1823 = vmatprep.subr.bf16.mxu0 %v2097_v0  ;;  %v2207_v13 = vpack.c.bf16 %v135_v11, %v134_v10  ;;  %v2106_v33 = vmov 6   ;;  %v280_v38 = vshrl.u32 %v48_v8, 7  ;;  %s2107_s13 = smov 120   ;;  %s2108_s14 = smov 104   ;;  %vm681_vm10 = vcmask 195584  }
  0x18   :  { %1818 = vmatpush3.bf16.msra.mxu1 %v2190_v5  ;;  %1967 = vset.pattern.permute.xlu1 %v2101_v25  ;;  %s2109_s15 = smov 112   ;;  %s2110_s16 = smov 8  }
  0x19   :  { %1831 = vmatprep.subr.bf16.mxu1 %v2097_v0  ;;  %v2243_v40 = vsub.s32 0, %v280_v38  ;;  %s2111_s17 = smov 16   ;;  %s2112_s22 = smov 24  }
  0x1b   :  { %1820 = vmatmul.mubr.msk.bf16.vlgmr.msra.gmra.mrb[0].mxu1 %vm153_vm1, %v152_v7  ;;  %1966 = vset.pattern.permute.xlu0 %v2100_v24 }
  0x1c   :  { %1833 = vmatprep.mubr.msk.bf16.mxu1 %vm2098_vm0, %v2097_v0 }
  0x96   :  { %v53_v12 = vpop.permute.xlu0 %52 }
  0x97   :  { %vm54_vm3 = vcmp.eq.s32.totalorder %v53_v12, %v49_v9 }
  0x98   :  { %v1742_v16 = vsel %vm54_vm3, 1.0, %v2097_v0 }
  0x99   :  { %1815 = vmatmul.mubr.msk.f32.vlgmr.msra.gmra.mrb[0].mxu0 %vm57_vm2, %v1742_v16 }
  0x9a   :  { %1824 = vmatpush3.bf16.msra.mxu0 %v2207_v13  ;;  %1827 = vmatprep.mubr.msk.bf16.mxu0 %vm2098_vm0, %v2097_v0 }
  0x9b   :  { %1825 = vmatprep.subr.bf16.mxu0 %v2097_v0 }
  0x9e   :  { %1826 = vmatpush3.bf16.msra.mxu0 %v2218_v17 }
  0x9f   :  { %1837 = vmatprep.subr.bf16.mxu0 %v2097_v0 }
  0xee   :  { %v191_v18 = vpop.f32.mrb[0].mxu1 }
  0xef   :  { %v2225_v19 = vpack.c.bf16 %v191_v18, %v191_v18  ;;  %v1821_v20 = vpop.f32.mrb[1].mxu1 }
  0xf0   :  { %v194_v21 = vpop.f32.mrb[2].mxu1 }
  0xf1   :  { %v1822_v22 = vpop.f32.mrb[3].mxu1  ;;  %1828 = vmatmul.mubr.msk.bf16.vlgmr.msra.gmra.mrb[4].mxu0 %vm198_vm4, %v2225_v19  ;;  %v303_v23 = vsel %vm302_vm5, %v2225_v19, 0 }
  0xf2   :  { %1832 = vmatpush3.bf16.msra.mxu1 %v303_v23  ;;  %1839 = vmatprep.mubr.msk.bf16.mxu0 %vm2098_vm0, %v2097_v0 }
  0xf3   :  { %1843 = vmatprep.subr.bf16.mxu1 %v2097_v0 }
 0x16c   :  { %v2236_v26 = vpop.f32.mrb[0].mxu0 }
 0x16d   :  { %v1816_v27 = vpop.f32.mrb[1].mxu0 }
 0x1c4   :  { %v236_v28 = vpop.f32.mrb[4].mxu0 }
 0x1c5   :  { %453 = vrot.lane.b32.xlu1 %v236_v28, %s2102_s3  ;;  %345 = vrot.lane.b32.xlu0 %v236_v28, %s2103_s11  ;;  %v1829_v29 = vpop.f32.mrb[5].mxu0 }
 0x1c6   :  { %v239_v30 = vpop.f32.mrb[6].mxu0 }
 0x1c7   :  { %v1830_v31 = vpop.f32.mrb[7].mxu0 }
 0x1c9   :  { %560 = vrot.lane.b32.xlu1 %v236_v28, %s2104_s12  ;;  %276 = vperm.xlu0 %1966, %v236_v28  }
 0x1cd   :  { %381 = vperm.xlu1 %1967, %v236_v28   ;;  %1969 = vset.pattern.permute.xlu0 %v2105_v32 }
 0x1ce   :  { %596 = vperm.xlu0 %1969, %v236_v28  }
 0x1d1   :  { %1968 = vset.pattern.permute.xlu1 %v2106_v33 }
 0x1d2   :  { %489 = vperm.xlu1 %1968, %v236_v28  }
 0x1fb   :  { %242 = vxpose.xlu1.b32.start.end [1/1] (short) (narrow) %v236_v28, 8 }
 0x237   :  { %v454_v34 = vpop.permute.xlu1 %453  ;;  %v346_v35 = vpop.permute.xlu0 %345 }
 0x238   :  { %348 = vxpose.xlu0.b32.start.end [1/1] (short) (narrow) %v346_v35, 8 }
 0x23b   :  { %v561_v36 = vpop.permute.xlu1 %560 }
 0x23c   :  { %563 = vxpose.xlu1.b32.start.end [1/1] (short) (narrow) %v561_v36, 8  ;;  %456 = vxpose.xlu0.b32.start.end [1/1] (short) (narrow) %v454_v34, 8 }
 0x248   :  { %v277_v43 = vpop.permute.xlu0 %276 }
 0x24c   :  { %v382_v37 = vpop.permute.xlu1 %381 }
 0x24d   :  { %v597_v48 = vpop.permute.xlu0 %596 }
 0x251   :  { %v490_v39 = vpop.permute.xlu1 %489 }
 0x27b   :  { %v258_v41 = vpop.trf.xlu1 }
 0x27c   :  { %v282_v42 = vrot.slane %v258_v41, %v2243_v40 }
 0x27e   :  { %v283_v44 = vadd.f32 %v282_v42, %v277_v43 }
 0x280   :  { %vm284_vm6 = vcmp.gt.f32.partialorder %v283_v44, 0.0  ;;  %v285_v45 = vmul.f32 0.01, %v283_v44 }
 0x282   :  { %v286_v46 = vsel %vm284_vm6, %v283_v44, %v285_v45 }
 0x283   :  { %v287_v47 = vsel %vm57_vm2, %v286_v46, -inf }
 0x284   :  { %288 = vmax.xlane.f32.xlu0 %v287_v47 }
 0x2b8   :  { %v364_v49 = vpop.trf.xlu0 }
 0x2b9   :  { %v387_v50 = vrot.slane %v364_v49, %v2243_v40 }
 0x2bb   :  { %v388_v51 = vadd.f32 %v387_v50, %v382_v37 }
 0x2bc   :  { %v579_v52 = vpop.trf.xlu1  ;;  %v472_v53 = vpop.trf.xlu0 }
 0x2bd   :  { %v602_v54 = vrot.slane %v579_v52, %v2243_v40  ;;  %v495_v55 = vrot.slane %v472_v53, %v2243_v40  ;;  %vm389_vm7 = vcmp.gt.f32.partialorder %v388_v51, 0.0  ;;  %v390_v56 = vmul.f32 0.01, %v388_v51 }
 0x2bf   :  { %v603_v57 = vadd.f32 %v602_v54, %v597_v48  ;;  %v496_v58 = vadd.f32 %v495_v55, %v490_v39  ;;  %v391_v59 = vsel %vm389_vm7, %v388_v51, %v390_v56 }
 0x2c0   :  { %v392_v60 = vsel %vm57_vm2, %v391_v59, -inf }
 0x2c1   :  { %393 = vmax.xlane.f32.xlu1 %v392_v60  ;;  %vm604_vm8 = vcmp.gt.f32.partialorder %v603_v57, 0.0  ;;  %v605_v61 = vmul.f32 0.01, %v603_v57  ;;  %vm497_vm9 = vcmp.gt.f32.partialorder %v496_v58, 0.0  ;;  %v498_v62 = vmul.f32 0.01, %v496_v58 }
 0x2c3   :  { %v606_v63 = vsel %vm604_vm8, %v603_v57, %v605_v61  ;;  %v499_v1 = vsel %vm497_vm9, %v496_v58, %v498_v62 }
 0x2c4   :  { %v607_v2 = vsel %vm57_vm2, %v606_v63, -inf  ;;  %v500_v3 = vsel %vm57_vm2, %v499_v1, -inf }
 0x2c5   :  { %608 = vmax.xlane.f32.xlu0 %v607_v2  ;;  %501 = vmax.xlane.f32.xlu1 %v500_v3  ;;  %v140_v3 = vld [vmem:[%s2485_s4] sm:$0xff] }
 0x2d6   :  { %405 = vrot.lane.b32.xlu1 %v2225_v19, %s2107_s13 }
 0x311   :  { %v289_v4 = vpop.xlane.xlu0 %288 }
 0x312   :  { %v290_v6 = vsub.f32 %v286_v46, %v289_v4  ;;  %v141_v4 = vld [vmem:[%s2485_s4 + $0x8] sm:$0xff] }
 0x314   :  { %v291_v7 = vmul.f32 1.442695, %v290_v6 }
 0x316   :  { %1976 = vpow2.f32 %v291_v7  ;;  %v2289_v7 = vpack.c.bf16 %v141_v4, %v140_v3 }
 0x320   :  { %v1977_v8 = vpop.eup %1976 }
 0x321   :  { %v293_v9 = vsel %vm57_vm2, %v1977_v8, 0.0 }
 0x322   :  { %294 = vadd.xlane.f32.xlu1 %v293_v9 }
 0x34e   :  { %v394_v10 = vpop.xlane.xlu1 %393 }
 0x34f   :  { %v395_v11 = vsub.f32 %v391_v59, %v394_v10 }
 0x351   :  { %v396_v12 = vmul.f32 1.442695, %v395_v11  ;;  %v142_v11 = vld [vmem:[%s2485_s4 + $0x10] sm:$0xff] }
 0x352   :  { %v502_v14 = vpop.xlane.xlu1 %501  ;;  %v609_v15 = vpop.xlane.xlu0 %608 }
 0x353   :  { %1978 = vpow2.f32 %v396_v12  ;;  %v503_v16 = vsub.f32 %v499_v1, %v502_v14  ;;  %v610_v18 = vsub.f32 %v606_v63, %v609_v15  ;;  %v143_v12 = vld [vmem:[%s2485_s4 + $0x18] sm:$0xff] }
 0x354   :  { %v2300_v15 = vpack.c.bf16 %v143_v12, %v142_v11 }
 0x355   :  { %v504_v20 = vmul.f32 1.442695, %v503_v16  ;;  %v611_v21 = vmul.f32 1.442695, %v610_v18  ;;  %v146_v16 = vld [vmem:[%s2486_s5] sm:$0xff]  ;;  %v147_v18 = vld [vmem:[%s2486_s5 + $0x8] sm:$0xff] }
 0x356   :  { %v406_v22 = vpop.permute.xlu1 %405 }
 0x357   :  { %1980 = vpow2.f32 %v504_v20  ;;  %v411_v23 = vsel %vm302_vm5, %v406_v22, 0  ;;  %v148_v20 = vld [vmem:[%s2486_s5 + $0x10] sm:$0xff]  ;;  %v149_v22 = vld [vmem:[%s2486_s5 + $0x18] sm:$0xff] }
 0x358   :  { %1982 = vpow2.f32 %v611_v21  ;;  %1838 = vmatpush3.bf16.msra.mxu0 %v411_v23  ;;  %v2313_v21 = vpack.c.bf16 %v147_v18, %v146_v16  ;;  %v2319_v23 = vpack.c.bf16 %v149_v22, %v148_v20 }
 0x359   :  { %1849 = vmatprep.subr.bf16.mxu0 %v2097_v0 }
 0x35d   :  { %v1979_v27 = vpop.eup %1978 }
 0x35e   :  { %v398_v28 = vsel %vm57_vm2, %v1979_v27, 0.0 }
 0x35f   :  { %399 = vadd.xlane.f32.xlu0 %v398_v28 }
 0x361   :  { %v1981_v29 = vpop.eup %1980 }
 0x362   :  { %v1983_v30 = vpop.eup %1982  ;;  %v506_v31 = vsel %vm57_vm2, %v1981_v29, 0.0 }
 0x363   :  { %507 = vadd.xlane.f32.xlu1 %v506_v31  ;;  %v613_v34 = vsel %vm57_vm2, %v1983_v30, 0.0 }
 0x364   :  { %614 = vadd.xlane.f32.xlu0 %v613_v34 }
 0x374   :  { %619 = vrot.lane.b32.xlu1 %v2225_v19, %s2108_s14 }
 0x37a   :  { %512 = vrot.lane.b32.xlu0 %v2225_v19, %s2109_s15 }
 0x3af   :  { %v295_v35 = vpop.xlane.xlu1 %294 }
 0x3b0   :  { %1984 = vrcp.f32 %v295_v35 }
 0x3ba   :  { %v1985_v36 = vpop.eup %1984 }
 0x3bb   :  { %v297_v37 = vmul.f32 %v1985_v36, %v1977_v8 }
 0x3bd   :  { %v298_v38 = vpack.c.bf16 %v297_v37, %v297_v37 }
 0x3bf   :  { %1834 = vmatmul.mubr.msk.bf16.vlgmr.msra.gmra.mrb[4].mxu1 %vm57_vm2, %v298_v38 }
 0x3c0   :  { %1845 = vmatprep.mubr.msk.bf16.mxu1 %vm2098_vm0, %v2097_v0 }
 0x3ec   :  { %v400_v39 = vpop.xlane.xlu0 %399 }
 0x3ed   :  { %1986 = vrcp.f32 %v400_v39 }
 0x3f0   :  { %v508_v41 = vpop.xlane.xlu1 %507 }
 0x3f1   :  { %1988 = vrcp.f32 %v508_v41  ;;  %v615_v42 = vpop.xlane.xlu0 %614  ;;  %v2113_v41 = vmov 1  }
 0x3f2   :  { %1990 = vrcp.f32 %v615_v42  ;;  %1970 = vset.pattern.permute.xlu0 %v2113_v41 }
 0x3f4   :  { %v620_v46 = vpop.permute.xlu1 %619 }
 0x3f5   :  { %v513_v43 = vpop.permute.xlu0 %512  ;;  %v625_v51 = vsel %vm302_vm5, %v620_v46, 0 }
 0x3f6   :  { %v518_v44 = vsel %vm302_vm5, %v513_v43, 0 }
 0x3f7   :  { %v1987_v19 = vpop.eup %1986  ;;  %1844 = vmatpush3.bf16.msra.mxu1 %v518_v44 }
 0x3f8   :  { %v402_v45 = vmul.f32 %v1987_v19, %v1979_v27  ;;  %1855 = vmatprep.subr.bf16.mxu1 %v2097_v0 }
 0x3fa   :  { %v403_v47 = vpack.c.bf16 %v402_v45, %v402_v45 }
 0x3fb   :  { %v1989_v48 = vpop.eup %1988 }
 0x3fc   :  { %v1991_v49 = vpop.eup %1990  ;;  %v510_v50 = vmul.f32 %v1989_v48, %v1981_v29  ;;  %1840 = vmatmul.mubr.msk.bf16.vlgmr.msra.gmra.mrb[8].mxu0 %vm57_vm2, %v403_v47  ;;  %v878_v47 = vpack.c.bf16 %v2236_v26, %v2236_v26 }
 0x3fd   :  { %1850 = vmatpush3.bf16.msra.mxu0 %v625_v51  ;;  %1851 = vmatprep.mubr.msk.bf16.mxu0 %vm2098_vm0, %v2097_v0  ;;  %v617_v52 = vmul.f32 %v1991_v49, %v1983_v30 }
 0x3fe   :  { %v511_v53 = vpack.c.bf16 %v510_v50, %v510_v50  ;;  %1863 = vmatprep.subr.bf16.mxu0 %v2097_v0 }
 0x3ff   :  { %v618_v54 = vpack.c.bf16 %v617_v52, %v617_v52 }
 0x400   :  { %1846 = vmatmul.mubr.msk.bf16.vlgmr.msra.gmra.mrb[8].mxu1 %vm57_vm2, %v511_v53 }
 0x401   :  { %1859 = vmatprep.mubr.msk.bf16.mxu1 %vm2098_vm0, %v2097_v0  ;;  %1856 = vmatpush3.bf16.msra.mxu1 %v2289_v7 }
 0x402   :  { %1857 = vmatprep.subr.bf16.mxu1 %v2097_v0 }
 0x404   :  { %1852 = vmatmul.mubr.msk.bf16.vlgmr.msra.gmra.mrb[12].mxu0 %vm57_vm2, %v618_v54 }
 0x405   :  { %1867 = vmatprep.mubr.msk.bf16.mxu0 %vm2098_vm0, %v2097_v0  ;;  %1858 = vmatpush3.bf16.msra.mxu1 %v2300_v15 }
 0x406   :  { %1871 = vmatprep.subr.bf16.mxu1 %v2097_v0  ;;  %1864 = vmatpush3.bf16.msra.mxu0 %v2313_v21 }
 0x407   :  { %1865 = vmatprep.subr.bf16.mxu0 %v2097_v0 }
 0x40a   :  { %1866 = vmatpush3.bf16.msra.mxu0 %v2319_v23 }
 0x40b   :  { %1877 = vmatprep.subr.bf16.mxu0 %v2097_v0 }
 0x492   :  { %v339_v55 = vpop.f32.mrb[4].mxu1 }
 0x493   :  { %v1835_v56 = vpop.f32.mrb[5].mxu1 }
 0x494   :  { %v342_v57 = vpop.f32.mrb[6].mxu1 }
 0x495   :  { %v1836_v58 = vpop.f32.mrb[7].mxu1 }
 0x4cf   :  { %v447_v59 = vpop.f32.mrb[8].mxu0 }
 0x4d0   :  { %668 = vrot.lane.b32.xlu1 %v447_v59, %s2110_s16  ;;  %v1841_v60 = vpop.f32.mrb[9].mxu0 }
 0x4d1   :  { %v450_v61 = vpop.f32.mrb[10].mxu0 }
 0x4d2   :  { %v1842_v62 = vpop.f32.mrb[11].mxu0 }
 0x4d3   :  { %v554_v63 = vpop.f32.mrb[8].mxu1 }
 0x4d4   :  { %672 = vrot.lane.b32.xlu0 %v554_v63, %s2111_s17  ;;  %v1847_v1 = vpop.f32.mrb[9].mxu1 }
 0x4d5   :  { %v557_v2 = vpop.f32.mrb[10].mxu1 }
 0x4d6   :  { %v1848_v6 = vpop.f32.mrb[11].mxu1 }
 0x4d7   :  { %v661_v8 = vpop.f32.mrb[12].mxu0 }
 0x4d8   :  { %676 = vrot.lane.b32.xlu1 %v661_v8, %s2112_s22  ;;  %v1853_v9 = vpop.f32.mrb[13].mxu0 }
 0x4d9   :  { %v664_v10 = vpop.f32.mrb[14].mxu0 }
 0x4da   :  { %v1854_v14 = vpop.f32.mrb[15].mxu0 }
 0x542   :  { %v669_v27 = vpop.permute.xlu1 %668 }
 0x543   :  { %v679_v29 = vsel %vm57_vm2, %v339_v55, %v669_v27 }
 0x546   :  { %v673_v28 = vpop.permute.xlu0 %672 }
 0x547   :  { %v680_v30 = vsel %vm153_vm1, %v679_v29, %v673_v28 }
 0x54a   :  { %v677_v31 = vpop.permute.xlu1 %676 }
 0x54b   :  { %v682_v34 = vsel %vm681_vm10, %v680_v30, %v677_v31 }
 0x54c   :  { %v684_v35 = vmul.f32 1.442695, %v682_v34  ;;  %vm683_vm11 = vcmp.gt.f32.partialorder %v682_v34, 0.0 }
 0x54e   :  { %1992 = vpow2.f32 %v684_v35 }
 0x558   :  { %v1993_v36 = vpop.eup %1992 }
 0x559   :  { %v1750_v37 = vadd.f32 -1.0, %v1993_v36 }
 0x55b   :  { %v687_v38 = vsel %vm683_vm11, %v682_v34, %v1750_v37 }
 0x55c   :  { %v688_v39 = vpack.c.bf16 %v687_v38, %v687_v38 }
 0x55e   :  { %1860 = vmatmul.mubr.msk.bf16.vlgmr.msra.gmra.mrb[12].mxu1 %vm198_vm4, %v688_v39 }
 0x55f   :  { %1873 = vmatprep.mubr.msk.bf16.mxu1 %vm2098_vm0, %v2097_v0 }
 0x631   :  { %v726_v42 = vpop.f32.mrb[12].mxu1 }
 0x632   :  { %v732_v43 = vpack.c.bf16 %v726_v42, %v726_v42  ;;  %v1861_v44 = vpop.f32.mrb[13].mxu1 }
 0x633   :  { %v729_v19 = vpop.f32.mrb[14].mxu1 }
 0x634   :  { %v836_v45 = vsel %vm302_vm5, %v732_v43, 0  ;;  %v1862_v46 = vpop.f32.mrb[15].mxu1  ;;  %1868 = vmatmul.mubr.msk.bf16.vlgmr.msra.gmra.mrb[16].mxu0 %vm198_vm4, %v732_v43 }
 0x635   :  { %1872 = vmatpush3.bf16.msra.mxu1 %v836_v45  ;;  %1878 = vmatpush3.bf16.msra.mxu0 %v2190_v5 }
 0x636   :  { %1879 = vmatprep.mubr.msk.bf16.mxu0 %vm2098_vm0, %v2097_v0  ;;  %1891 = vmatprep.subr.bf16.mxu0 %v2097_v0 }
 0x637   :  { %1883 = vmatprep.subr.bf16.mxu1 %v2097_v0 }
 0x63c   :  { %1880 = vmatmul.mubr.msk.bf16.vlgmr.msra.gmra.mrb[20].mxu0 %vm153_vm1, %v878_v47 }
 0x63d   :  { %1893 = vmatprep.mubr.msk.bf16.mxu0 %vm2098_vm0, %v2097_v0 }
 0x707   :  { %v770_v48 = vpop.f32.mrb[16].mxu0 }
 0x708   :  { %776 = vxpose.xlu1.b32.start.end [1/1] (short) (narrow) %v770_v48, 8  ;;  %810 = vperm.xlu0 %1970, %v770_v48   ;;  %v1869_v49 = vpop.f32.mrb[17].mxu0 }
 0x709   :  { %v773_v5 = vpop.f32.mrb[18].mxu0 }
 0x70a   :  { %v1870_v50 = vpop.f32.mrb[19].mxu0 }
 0x70c   :  { %1971 = vset.pattern.permute.xlu0 %v2100_v24 }
 0x70f   :  { %v916_v51 = vpop.f32.mrb[20].mxu0 }
 0x710   :  { %v2344_v52 = vpack.c.bf16 %v916_v51, %v916_v51  ;;  %v1881_v53 = vpop.f32.mrb[21].mxu0 }
 0x711   :  { %v919_v54 = vpop.f32.mrb[22].mxu0 }
 0x712   :  { %v1882_v55 = vpop.f32.mrb[23].mxu0  ;;  %v1026_v26 = vsel %vm302_vm5, %v2344_v52, 0 }
 0x713   :  { %1892 = vmatpush3.bf16.msra.mxu0 %v1026_v26 }
 0x714   :  { %1903 = vmatprep.subr.bf16.mxu0 %v2097_v0 }
 0x726   :  { %1972 = vset.pattern.permute.xlu1 %v2101_v25 }
 0x787   :  { %v811_v58 = vpop.permute.xlu0 %810 }
 0x788   :  { %v792_v56 = vpop.trf.xlu1 }
 0x789   :  { %v816_v57 = vrot.slane %v792_v56, %v2243_v40 }
 0x78b   :  { %v817_v59 = vadd.f32 %v816_v57, %v811_v58 }
 0x78d   :  { %vm818_vm12 = vcmp.gt.f32.partialorder %v817_v59, 0.0  ;;  %v819_v24 = vmul.f32 0.01, %v817_v59 }
 0x78f   :  { %v820_v60 = vsel %vm818_vm12, %v817_v59, %v819_v24 }
 0x790   :  { %v821_v61 = vsel %vm57_vm2, %v820_v60, -inf }
 0x791   :  { %822 = vmax.xlane.f32.xlu0 %v821_v61 }
 0x81e   :  { %v823_v62 = vpop.xlane.xlu0 %822 }
 0x81f   :  { %v824_v63 = vsub.f32 %v820_v60, %v823_v62 }
 0x821   :  { %v825_v1 = vmul.f32 1.442695, %v824_v63 }
 0x823   :  { %1994 = vpow2.f32 %v825_v1 }
 0x82d   :  { %v1995_v2 = vpop.eup %1994 }
 0x82e   :  { %v827_v3 = vsel %vm57_vm2, %v1995_v2, 0.0 }
 0x82f   :  { %828 = vadd.xlane.f32.xlu0 %v827_v3 }
 0x8bc   :  { %v829_v25 = vpop.xlane.xlu0 %828 }
 0x8bd   :  { %1996 = vrcp.f32 %v829_v25 }
 0x8c7   :  { %v1997_v4 = vpop.eup %1996 }
 0x8c8   :  { %v831_v6 = vmul.f32 %v1997_v4, %v1995_v2 }
 0x8ca   :  { %v832_v8 = vpack.c.bf16 %v831_v6, %v831_v6 }
 0x8cc   :  { %1874 = vmatmul.mubr.msk.bf16.vlgmr.msra.gmra.mrb[16].mxu1 %vm57_vm2, %v832_v8 }
 0x8cd   :  { %1884 = vmatpush3.bf16.msra.mxu1 %v2207_v13  ;;  %1887 = vmatprep.mubr.msk.bf16.mxu1 %vm2098_vm0, %v2097_v0 }
 0x8ce   :  { %1885 = vmatprep.subr.bf16.mxu1 %v2097_v0 }
 0x8d1   :  { %1886 = vmatpush3.bf16.msra.mxu1 %v2218_v17 }
 0x8d2   :  { %1897 = vmatprep.subr.bf16.mxu1 %v2097_v0 }
 0x8d4   :  { %1888 = vmatmul.mubr.msk.bf16.vlgmr.msra.gmra.mrb[20].mxu1 %vm198_vm4, %v2344_v52 }
 0x8d5   :  { %1899 = vmatprep.mubr.msk.bf16.mxu1 %vm2098_vm0, %v2097_v0 }
 0x99f   :  { %v2364_v9 = vpop.f32.mrb[16].mxu1 }
 0x9a0   :  { %1678 = vst.msk [vmem:[#allocation6] sm:$0xff] %vm198_vm4, %v2364_v9  ;;  %v1875_v13 = vpop.f32.mrb[17].mxu1 }
 0x9a1   :  { %v875_v10 = vpop.f32.mrb[18].mxu1 }
 0x9a2   :  { %v1876_v11 = vpop.f32.mrb[19].mxu1 }
 0x9a7   :  { %v960_v12 = vpop.f32.mrb[20].mxu1 }
 0x9a8   :  { %1176 = vrot.lane.b32.xlu0 %v960_v12, %s2102_s3  ;;  %1068 = vrot.lane.b32.xlu1 %v960_v12, %s2103_s11  ;;  %v1889_v17 = vpop.f32.mrb[21].mxu1 }
 0x9a9   :  { %v963_v14 = vpop.f32.mrb[22].mxu1 }
 0x9aa   :  { %v1890_v16 = vpop.f32.mrb[23].mxu1 }
 0x9ac   :  { %1283 = vrot.lane.b32.xlu0 %v960_v12, %s2104_s12  ;;  %1104 = vperm.xlu1 %1972, %v960_v12  }
 0x9b0   :  { %1000 = vperm.xlu0 %1971, %v960_v12   ;;  %1973 = vset.pattern.permute.xlu1 %v2106_v33 }
 0x9b1   :  { %1212 = vperm.xlu1 %1973, %v960_v12  }
 0x9b4   :  { %1974 = vset.pattern.permute.xlu0 %v2105_v32 }
 0x9b5   :  { %1319 = vperm.xlu0 %1974, %v960_v12  }
 0x9da   :  { %966 = vxpose.xlu1.b32.start.end [1/1] (short) (narrow) %v960_v12, 8 }
 0xa1a   :  { %v1069_v18 = vpop.permute.xlu1 %1068  ;;  %v1177_v20 = vpop.permute.xlu0 %1176 }
 0xa1b   :  { %1071 = vxpose.xlu0.b32.start.end [1/1] (short) (narrow) %v1069_v18, 8 }
 0xa1e   :  { %v1284_v22 = vpop.permute.xlu0 %1283 }
 0xa1f   :  { %1179 = vxpose.xlu0.b32.start.end [1/1] (short) (narrow) %v1177_v20, 8 }
 0xa23   :  { %1286 = vxpose.xlu0.b32.start.end [1/1] (short) (narrow) %v1284_v22, 8 }
 0xa2b   :  { %v1105_v27 = vpop.permute.xlu1 %1104 }
 0xa2f   :  { %v1001_v31 = vpop.permute.xlu0 %1000 }
 0xa30   :  { %v1213_v28 = vpop.permute.xlu1 %1212 }
 0xa34   :  { %v1320_v36 = vpop.permute.xlu0 %1319 }
 0xa4c   :  { %1975 = vset.pattern.permute.xlu0 %v2113_v41 }
 0xa5a   :  { %v982_v29 = vpop.trf.xlu1 }
 0xa5b   :  { %v1006_v30 = vrot.slane %v982_v29, %v2243_v40 }
 0xa5d   :  { %v1007_v33 = vadd.f32 %v1006_v30, %v1001_v31 }
 0xa5f   :  { %vm1008_vm13 = vcmp.gt.f32.partialorder %v1007_v33, 0.0  ;;  %v1009_v34 = vmul.f32 0.01, %v1007_v33 }
 0xa61   :  { %v1010_v32 = vsel %vm1008_vm13, %v1007_v33, %v1009_v34 }
 0xa62   :  { %v1011_v35 = vsel %vm57_vm2, %v1010_v32, -inf }
 0xa63   :  { %1012 = vmax.xlane.f32.xlu1 %v1011_v35 }
 0xa9b   :  { %v1087_v37 = vpop.trf.xlu0 }
 0xa9c   :  { %v1110_v38 = vrot.slane %v1087_v37, %v2243_v40 }
 0xa9e   :  { %v1111_v39 = vadd.f32 %v1110_v38, %v1105_v27 }
 0xa9f   :  { %v1195_v42 = vpop.trf.xlu0 }
 0xaa0   :  { %v1218_v41 = vrot.slane %v1195_v42, %v2243_v40  ;;  %vm1112_vm14 = vcmp.gt.f32.partialorder %v1111_v39, 0.0  ;;  %v1113_v43 = vmul.f32 0.01, %v1111_v39 }
 0xaa2   :  { %v1219_v44 = vadd.f32 %v1218_v41, %v1213_v28  ;;  %v1114_v19 = vsel %vm1112_vm14, %v1111_v39, %v1113_v43 }
 0xaa3   :  { %v1302_v45 = vpop.trf.xlu0  ;;  %v1115_v46 = vsel %vm57_vm2, %v1114_v19, -inf }
 0xaa4   :  { %v1325_v47 = vrot.slane %v1302_v45, %v2243_v40  ;;  %1116 = vmax.xlane.f32.xlu0 %v1115_v46  ;;  %vm1220_vm15 = vcmp.gt.f32.partialorder %v1219_v44, 0.0  ;;  %v1221_v48 = vmul.f32 0.01, %v1219_v44 }
 0xaa6   :  { %v1326_v49 = vadd.f32 %v1325_v47, %v1320_v36  ;;  %v1222_v5 = vsel %vm1220_vm15, %v1219_v44, %v1221_v48 }
 0xaa7   :  { %v1223_v50 = vsel %vm57_vm2, %v1222_v5, -inf }
 0xaa8   :  { %1224 = vmax.xlane.f32.xlu1 %v1223_v50  ;;  %vm1327_vm3 = vcmp.gt.f32.partialorder %v1326_v49, 0.0  ;;  %v1328_v51 = vmul.f32 0.01, %v1326_v49 }
 0xaaa   :  { %v1329_v53 = vsel %vm1327_vm3, %v1326_v49, %v1328_v51 }
 0xaab   :  { %v1330_v54 = vsel %vm57_vm2, %v1329_v53, -inf }
 0xaac   :  { %1331 = vmax.xlane.f32.xlu1 %v1330_v54 }
 0xabd   :  { %1128 = vrot.lane.b32.xlu1 %v2344_v52, %s2107_s13 }
 0xaf0   :  { %v1013_v55 = vpop.xlane.xlu1 %1012 }
 0xaf1   :  { %v1014_v26 = vsub.f32 %v1010_v32, %v1013_v55 }
 0xaf3   :  { %v1015_v56 = vmul.f32 1.442695, %v1014_v26 }
 0xaf5   :  { %1998 = vpow2.f32 %v1015_v56 }
 0xaff   :  { %v1999_v57 = vpop.eup %1998 }
 0xb00   :  { %v1017_v58 = vsel %vm57_vm2, %v1999_v57, 0.0 }
 0xb01   :  { %1018 = vadd.xlane.f32.xlu1 %v1017_v58 }
 0xb31   :  { %v1117_v59 = vpop.xlane.xlu0 %1116 }
 0xb32   :  { %v1118_v24 = vsub.f32 %v1114_v19, %v1117_v59 }
 0xb34   :  { %v1119_v60 = vmul.f32 1.442695, %v1118_v24 }
 0xb35   :  { %v1225_v61 = vpop.xlane.xlu1 %1224 }
 0xb36   :  { %2000 = vpow2.f32 %v1119_v60  ;;  %v1226_v62 = vsub.f32 %v1222_v5, %v1225_v61 }
 0xb38   :  { %v1227_v63 = vmul.f32 1.442695, %v1226_v62 }
 0xb39   :  { %v1332_v1 = vpop.xlane.xlu1 %1331 }
 0xb3a   :  { %2002 = vpow2.f32 %v1227_v63  ;;  %v1333_v2 = vsub.f32 %v1329_v53, %v1332_v1 }
 0xb3c   :  { %v1334_v3 = vmul.f32 1.442695, %v1333_v2 }
 0xb3d   :  { %v1129_v25 = vpop.permute.xlu1 %1128 }
 0xb3e   :  { %2004 = vpow2.f32 %v1334_v3  ;;  %v1134_v4 = vsel %vm302_vm5, %v1129_v25, 0 }
 0xb3f   :  { %1898 = vmatpush3.bf16.msra.mxu1 %v1134_v4 }
 0xb40   :  { %v2001_v6 = vpop.eup %2000  ;;  %1909 = vmatprep.subr.bf16.mxu1 %v2097_v0 }
 0xb41   :  { %v1121_v8 = vsel %vm57_vm2, %v2001_v6, 0.0 }
 0xb42   :  { %1122 = vadd.xlane.f32.xlu0 %v1121_v8 }
 0xb44   :  { %v2003_v13 = vpop.eup %2002 }
 0xb45   :  { %v1229_v10 = vsel %vm57_vm2, %v2003_v13, 0.0 }
 0xb46   :  { %1230 = vadd.xlane.f32.xlu1 %v1229_v10 }
 0xb48   :  { %v2005_v11 = vpop.eup %2004 }
 0xb49   :  { %v1336_v12 = vsel %vm57_vm2, %v2005_v11, 0.0 }
 0xb4a   :  { %1337 = vadd.xlane.f32.xlu0 %v1336_v12 }
 0xb57   :  { %1342 = vrot.lane.b32.xlu1 %v2344_v52, %s2108_s14 }
 0xb60   :  { %1235 = vrot.lane.b32.xlu0 %v2344_v52, %s2109_s15 }
 0xb8e   :  { %v1019_v17 = vpop.xlane.xlu1 %1018 }
 0xb8f   :  { %2006 = vrcp.f32 %v1019_v17 }
 0xb99   :  { %v2007_v14 = vpop.eup %2006 }
 0xb9a   :  { %v1021_v16 = vmul.f32 %v2007_v14, %v1999_v57 }
 0xb9c   :  { %v1022_v18 = vpack.c.bf16 %v1021_v16, %v1021_v16 }
 0xb9e   :  { %1894 = vmatmul.mubr.msk.bf16.vlgmr.msra.gmra.mrb[24].mxu0 %vm57_vm2, %v1022_v18 }
 0xb9f   :  { %1905 = vmatprep.mubr.msk.bf16.mxu0 %vm2098_vm0, %v2097_v0 }
 0xbcf   :  { %v1123_v20 = vpop.xlane.xlu0 %1122 }
 0xbd0   :  { %2008 = vrcp.f32 %v1123_v20 }
 0xbd3   :  { %v1231_v22 = vpop.xlane.xlu1 %1230 }
 0xbd4   :  { %2010 = vrcp.f32 %v1231_v22 }
 0xbd7   :  { %v1338_v27 = vpop.xlane.xlu0 %1337  ;;  %v1343_v52 = vpop.permute.xlu1 %1342 }
 0xbd8   :  { %2012 = vrcp.f32 %v1338_v27  ;;  %v1348_v35 = vsel %vm302_vm5, %v1343_v52, 0 }
 0xbda   :  { %v2009_v28 = vpop.eup %2008 }
 0xbdb   :  { %v1125_v29 = vmul.f32 %v2009_v28, %v2001_v6  ;;  %v1236_v30 = vpop.permute.xlu0 %1235 }
 0xbdc   :  { %v1241_v31 = vsel %vm302_vm5, %v1236_v30, 0  ;;  %v1618_v30 = vld [vmem:[%s2487_s6 + $0x10] sm:$0xff] }
 0xbdd   :  { %1904 = vmatpush3.bf16.msra.mxu0 %v1241_v31  ;;  %v1126_v33 = vpack.c.bf16 %v1125_v29, %v1125_v29  ;;  %v1617_v29 = vld [vmem:[%s2487_s6 + $0x8] sm:$0xff]  ;;  %v1619_v31 = vld [vmem:[%s2487_s6 + $0x18] sm:$0xff] }
 0xbde   :  { %v2011_v34 = vpop.eup %2010  ;;  %1915 = vmatprep.subr.bf16.mxu0 %v2097_v0 }
 0xbdf   :  { %v1233_v32 = vmul.f32 %v2011_v34, %v2003_v13  ;;  %1900 = vmatmul.mubr.msk.bf16.vlgmr.msra.gmra.mrb[24].mxu1 %vm57_vm2, %v1126_v33  ;;  %v1621_v33 = vpack.c.bf16 %v1619_v31, %v1618_v30 }
 0xbe0   :  { %1910 = vmatpush3.bf16.msra.mxu1 %v1348_v35  ;;  %1911 = vmatprep.mubr.msk.bf16.mxu1 %vm2098_vm0, %v2097_v0 }
 0xbe1   :  { %v1234_v36 = vpack.c.bf16 %v1233_v32, %v1233_v32  ;;  %1923 = vmatprep.subr.bf16.mxu1 %v2097_v0 }
 0xbe2   :  { %v2013_v37 = vpop.eup %2012 }
 0xbe3   :  { %v1340_v38 = vmul.f32 %v2013_v37, %v2005_v11  ;;  %1906 = vmatmul.mubr.msk.bf16.vlgmr.msra.gmra.mrb[28].mxu0 %vm57_vm2, %v1234_v36 }
 0xbe4   :  { %1916 = vmatpush3.bf16.msra.mxu0 %v2289_v7  ;;  %1919 = vmatprep.mubr.msk.bf16.mxu0 %vm2098_vm0, %v2097_v0 }
 0xbe5   :  { %v1341_v39 = vpack.c.bf16 %v1340_v38, %v1340_v38  ;;  %1917 = vmatprep.subr.bf16.mxu0 %v2097_v0 }
 0xbe7   :  { %1912 = vmatmul.mubr.msk.bf16.vlgmr.msra.gmra.mrb[28].mxu1 %vm57_vm2, %v1341_v39 }
 0xbe8   :  { %1918 = vmatpush3.bf16.msra.mxu0 %v2300_v15  ;;  %1924 = vmatpush3.bf16.msra.mxu1 %v2313_v21 }
 0xbe9   :  { %1925 = vmatprep.subr.bf16.mxu1 %v2097_v0  ;;  %1927 = vmatprep.mubr.msk.bf16.mxu1 %vm2098_vm0, %v2097_v0 }
 0xbea   :  { %1931 = vmatprep.subr.bf16.mxu0 %v2097_v0 }
 0xbec   :  { %1926 = vmatpush3.bf16.msra.mxu1 %v2319_v23 }
 0xbed   :  { %1937 = vmatprep.subr.bf16.mxu1 %v2097_v0 }
 0xc71   :  { %v1062_v7 = vpop.f32.mrb[24].mxu0 }
 0xc72   :  { %v1895_v42 = vpop.f32.mrb[25].mxu0 }
 0xc73   :  { %v1065_v41 = vpop.f32.mrb[26].mxu0 }
 0xc74   :  { %v1896_v43 = vpop.f32.mrb[27].mxu0  ;;  %v1600_v41 = vsel %vm198_vm4, %v2364_v9, 0.0 }
 0xcb2   :  { %v1170_v44 = vpop.f32.mrb[24].mxu1 }
 0xcb3   :  { %1391 = vrot.lane.b32.xlu1 %v1170_v44, %s2110_s16  ;;  %v1901_v15 = vpop.f32.mrb[25].mxu1 }
 0xcb4   :  { %v1173_v21 = vpop.f32.mrb[26].mxu1 }
 0xcb5   :  { %v1902_v19 = vpop.f32.mrb[27].mxu1 }
 0xcb6   :  { %v1277_v45 = vpop.f32.mrb[28].mxu0 }
 0xcb7   :  { %1395 = vrot.lane.b32.xlu0 %v1277_v45, %s2111_s17  ;;  %v1907_v46 = vpop.f32.mrb[29].mxu0  ;;  %s2114_s17 = smov [#allocation6]  }
 0xcb8   :  { %v1280_v47 = vpop.f32.mrb[30].mxu0  ;;  %s1719_s18 = sshll.u32 %s2114_s17, 4  ;;  %s1720_s18 = int_to_ptr.vmem [resolvable:$true] %s1719_s18 }
 0xcb9   :  { %v1908_v48 = vpop.f32.mrb[31].mxu0  ;;  %s2046_s19 = scalar_lea.vmem %s1720_s18, 128  ;;  %p2051_p9 = scmp.lt.s32.totalorder %s1720_s18, %s1720_s18 }
 0xcba   :  { %v1384_v49 = vpop.f32.mrb[28].mxu1  ;;  %p2047_p8 = scmp.ne.s32.totalorder %s1720_s18, %s2046_s19  ;;  %p2052_p10 = scmp.lt.s32.totalorder %s2046_s19, %s2046_s19 }
 0xcbb   :  { %1399 = vrot.lane.b32.xlu1 %v1384_v49, %s2112_s22  ;;  %v1913_v23 = vpop.f32.mrb[29].mxu1 }
 0xcbc   :  { %v1387_v5 = vpop.f32.mrb[30].mxu1  ;;  %p2053_p11 = por %p2052_p10, %p2051_p9 }
 0xcbd   :  { %v1914_v50 = vpop.f32.mrb[31].mxu1 }
 0xcbe   :  { %p2054_p12 = pnand %p2053_p11, %p2047_p8 }
 0xd25   :  { %v1392_v51 = vpop.permute.xlu1 %1391 }
 0xd26   :  { %v1402_v54 = vsel %vm57_vm2, %v1062_v7, %v1392_v51 }
 0xd29   :  { %v1396_v53 = vpop.permute.xlu0 %1395 }
 0xd2a   :  { %v1403_v55 = vsel %vm153_vm1, %v1402_v54, %v1396_v53 }
 0xd2d   :  { %v1400_v26 = vpop.permute.xlu1 %1399 }
 0xd2e   :  { %v1404_v56 = vsel %vm681_vm10, %v1403_v55, %v1400_v26 }
 0xd2f   :  { %v1406_v57 = vmul.f32 1.442695, %v1404_v56  ;;  %vm1405_vm6 = vcmp.gt.f32.partialorder %v1404_v56, 0.0 }
 0xd31   :  { %2014 = vpow2.f32 %v1406_v57 }
 0xd3b   :  { %v2015_v58 = vpop.eup %2014 }
 0xd3c   :  { %v1760_v59 = vadd.f32 -1.0, %v2015_v58 }
 0xd3e   :  { %v1409_v24 = vsel %vm1405_vm6, %v1404_v56, %v1760_v59  ;;  %v1675_v56 = vstv %s2488_s7 }
 0xd3f   :  { %v1410_v60 = vpack.c.bf16 %v1409_v24, %v1409_v24 }
 0xd41   :  { %1920 = vmatmul.mubr.msk.bf16.vlgmr.msra.gmra.mrb[32].mxu0 %vm198_vm4, %v1410_v60 }
 0xd42   :  { %1933 = vmatprep.mubr.msk.bf16.mxu0 %vm2098_vm0, %v2097_v0 }
 0xe14   :  { %v1448_v61 = vpop.f32.mrb[32].mxu0 }
 0xe15   :  { %v1454_v62 = vpack.c.bf16 %v1448_v61, %v1448_v61  ;;  %v1921_v63 = vpop.f32.mrb[33].mxu0 }
 0xe16   :  { %v1451_v1 = vpop.f32.mrb[34].mxu0 }
 0xe17   :  { %v1558_v2 = vsel %vm302_vm5, %v1454_v62, 0  ;;  %v1922_v3 = vpop.f32.mrb[35].mxu0  ;;  %1928 = vmatmul.mubr.msk.bf16.vlgmr.msra.gmra.mrb[32].mxu1 %vm198_vm4, %v1454_v62 }
 0xe18   :  { %1932 = vmatpush3.bf16.msra.mxu0 %v1558_v2  ;;  %1941 = vmatprep.mubr.msk.bf16.mxu1 %vm2098_vm0, %v2097_v0 }
 0xeea   :  { %v1492_v25 = vpop.f32.mrb[32].mxu1 }
 0xeeb   :  { %1498 = vxpose.xlu1.b32.start.end [1/1] (short) (narrow) %v1492_v25, 8  ;;  %1532 = vperm.xlu0 %1975, %v1492_v25   ;;  %v1929_v4 = vpop.f32.mrb[33].mxu1 }
 0xeec   :  { %v1495_v6 = vpop.f32.mrb[34].mxu1 }
 0xeed   :  { %v1930_v8 = vpop.f32.mrb[35].mxu1 }
 0xf6a   :  { %v1533_v11 = vpop.permute.xlu0 %1532 }
 0xf6b   :  { %v1514_v13 = vpop.trf.xlu1 }
 0xf6c   :  { %v1538_v10 = vrot.slane %v1514_v13, %v2243_v40  ;;  %v1616_v40 = vld [vmem:[%s2487_s6] sm:$0xff] }
 0xf6d   :  { %v1620_v52 = vpack.c.bf16 %v1617_v29, %v1616_v40 }
 0xf6e   :  { %v1539_v12 = vadd.f32 %v1538_v10, %v1533_v11 }
 0xf6f   :  { %1938 = vmatpush3.bf16.msra.mxu1 %v1620_v52 }
 0xf70   :  { %vm1540_vm1 = vcmp.gt.f32.partialorder %v1539_v12, 0.0  ;;  %v1541_v17 = vmul.f32 0.01, %v1539_v12  ;;  %1939 = vmatprep.subr.bf16.mxu1 %v2097_v0  ;;  %v1601_v0 = vrot.slane %v1600_v41, 4 }
 0xf72   :  { %v1542_v14 = vsel %vm1540_vm1, %v1539_v12, %v1541_v17  ;;  %v1602_v43 = vadd.f32 %v1601_v0, %v1600_v41 }
 0xf73   :  { %v1543_v16 = vsel %vm57_vm2, %v1542_v14, -inf  ;;  %1940 = vmatpush3.bf16.msra.mxu1 %v1621_v33 }
 0xf74   :  { %1544 = vmax.xlane.f32.xlu0 %v1543_v16  ;;  %v1603_v44 = vrot.slane %v1602_v43, 2 }
 0xf76   :  { %v1604_v15 = vadd.f32 %v1603_v44, %v1602_v43 }
 0xf78   :  { %v1605_v21 = vrot.slane %v1604_v15, 1 }
 0xf7a   :  { %v1606_v19 = vadd.f32 %v1605_v21, %v1604_v15 }
 0xf7c   :  { %v1608_v45 = vmul.f32 0.125, %v1606_v19 }
 0xf7e   :  { %v1609_v46 = vsub.f32 0.0, %v1608_v45 }
 0xf80   :  { %v1610_v47 = vmul.f32 1.442695, %v1609_v46 }
0x1001   :  { %v1545_v18 = vpop.xlane.xlu0 %1544 }
0x1002   :  { %v1546_v20 = vsub.f32 %v1542_v14, %v1545_v18 }
0x1004   :  { %v1547_v22 = vmul.f32 1.442695, %v1546_v20 }
0x1006   :  { %2016 = vpow2.f32 %v1547_v22 }
0x1010   :  { %v2017_v27 = vpop.eup %2016 }
0x1011   :  { %v1549_v28 = vsel %vm57_vm2, %v2017_v27, 0.0 }
0x1012   :  { %1550 = vadd.xlane.f32.xlu0 %v1549_v28 }
0x109f   :  { %v1551_v34 = vpop.xlane.xlu0 %1550 }
0x10a0   :  { %2018 = vrcp.f32 %v1551_v34 }
0x10a1   :  { %2020 = vpow2.f32 %v1610_v47 }
0x10aa   :  { %v2019_v32 = vpop.eup %2018 }
0x10ab   :  { %v1553_v35 = vmul.f32 %v2019_v32, %v2017_v27  ;;  %v2021_v48 = vpop.eup %2020 }
0x10ac   :  { %v1612_v49 = vadd.f32 1.0, %v2021_v48 }
0x10ad   :  { %v1554_v36 = vpack.c.bf16 %v1553_v35, %v1553_v35 }
0x10ae   :  { %2022 = vrcp.f32 %v1612_v49 }
0x10af   :  { %1934 = vmatmul.mubr.msk.bf16.vlgmr.msra.gmra.mrb[36].mxu0 %vm57_vm2, %v1554_v36 }
0x10b8   :  { %v2023_v23 = vpop.eup %2022 }
0x1182   :  { %v1594_v37 = vpop.f32.mrb[36].mxu0 }
0x1183   :  { %v1615_v38 = vpack.c.bf16 %v1594_v37, %v2364_v9  ;;  %v1935_v39 = vpop.f32.mrb[37].mxu0 }
0x1184   :  { %v1597_v7 = vpop.f32.mrb[38].mxu0 }
0x1185   :  { %v1936_v42 = vpop.f32.mrb[39].mxu0  ;;  %1942 = vmatmul.mubr.msk.bf16.vlgmr.msra.gmra.mrb[36].mxu1 %vm198_vm4, %v1615_v38 }
0x1258   :  { %v1659_v5 = vpop.f32.mrb[36].mxu1 }
0x1259   :  { %v1666_v50 = vmul.f32 %v2023_v23, %v1659_v5  ;;  %v1943_v51 = vpop.f32.mrb[37].mxu1 }
0x125a   :  { %v1662_v53 = vpop.f32.mrb[38].mxu1 }
0x125b   :  { %v1667_v54 = vmul.f32 %v2023_v23, %v1662_v53  ;;  %v1944_v9 = vpop.f32.mrb[39].mxu1  ;;  %v1668_v55 = vsel %vm198_vm4, %v1666_v50, 0.0 }
0x125c   :  { %1669 = vadd.xlane.f32.xlu0 %v1668_v55 }
0x125d   :  { %v1671_v26 = vsel %vm198_vm4, %v1667_v54, 0.0 }
0x125e   :  { %1672 = vadd.xlane.f32.xlu1 %v1671_v26 }
0x12e9   :  { %v1670_v57 = vpop.xlane.xlu0 %1669 }
0x12ea   :  { %v1676_v58 = vadd.f32 %v1675_v56, %v1670_v57 }
0x12eb   :  { %v1673_v59 = vpop.xlane.xlu1 %1672 }
0x12ec   :  { %1679 = vxpose.xlu0.b32.start [1/2] (short) (narrow) %v1676_v58, 8  ;;  %v1677_v24 = vadd.f32 %v1675_v56, %v1673_v59 }
0x12ed   :  { %2057 = shalt.err (!%p2054_p12)
}
0x12ee   :  { %s2058_s22 = scalar_lea.hbm %s2489_s8, 128 }
0x12ef   :  { %p2059_p13 = scmp.ne.s32.totalorder %s2489_s8, %s2058_s22  ;;  %p2062_p0 = scmp.lt.u32.totalorder %s2058_s22, %s2489_s8 }
0x12f1   :  { %p2064_p1 = pnand %p2062_p0, %p2059_p13 }
0x12f3   :  { %2067 = shalt.err (!%p2064_p1)
}
0x12f4   :  { %1722 = dma.vmem_to_hbm [thread:$0]  %s1720_s18, 128, %s2489_s8, [#allocation5]   ;;  %1680 = vxpose.xlu0.b32.end [2/2] (short) (narrow) %v1677_v24, 8  ;;  %vm1711_vm0 = vcmask 122880  }
0x12f5   :  { %s2115_s26 = smov [#allocation7]  }
0x12f6   :  { %s1729_s1 = sshll.u32 %s2115_s26, 4  ;;  %s1730_s1 = int_to_ptr.vmem [resolvable:$true] %s1729_s1 }
0x12f7   :  { %s2068_s27 = scalar_lea.vmem %s1730_s1, 16  ;;  %s2072_s28 = scalar_lea.vmem %s1730_s1, 32 }
0x12f8   :  { %p2069_p2 = scmp.ne.s32.totalorder %s1730_s1, %s2068_s27  ;;  %p2073_p3 = scmp.lt.s32.totalorder %s1730_s1, %s1730_s1 }
0x12f9   :  { %p2074_p4 = scmp.lt.s32.totalorder %s2072_s28, %s2068_s27 }
0x12fb   :  { %p2075_p5 = por %p2074_p4, %p2073_p3 }
0x12fd   :  { %p2076_p6 = pnand %p2075_p5, %p2069_p2 }
0x1370   :  { %v1695_v60 = vpop.trf.xlu0 }
0x1371   :  { %1712 = vst.msk [vmem:[#allocation7] sm:$0x1] %vm1711_vm0, %v1695_v60 }
0x1372   :  { %2079 = shalt.err (!%p2076_p6)
}
0x1373   :  { %s2080_s30 = scalar_lea.hbm %s2490_s9, 16 }
0x1374   :  { %p2081_p7 = scmp.ne.s32.totalorder %s2490_s9, %s2080_s30  ;;  %p2084_p8 = scmp.lt.u32.totalorder %s2080_s30, %s2490_s9 }
0x1376   :  { %p2086_p9 = pnand %p2084_p8, %p2081_p7 }
0x1378   :  { %2089 = shalt.err (!%p2086_p9)
}
0x1379   :  { %1732 = dma.vmem_to_hbm [thread:$0]  %s1730_s1, 16, %s2490_s9, [#allocation8]  }
0x137a   :  { %2092 = dma.done.wait [#allocation5], 128  }
0x137b   :  { %2093 = vsyncadd [#allocation5], 4294967168 }
0x137c   :  { %2094 = dma.done.wait [#allocation8], 16  }
0x137d   :  { %2095 = vsyncadd [#allocation8], 4294967280 }
0x137e   :  { %1739 = vsyncpa [#allocation4], 1 }
0x137f   :  { %1740 = vsyncpa [#allocation5], 1 }
0x1380   :  { %1741 = vsyncpa [#allocation8], 1 }

</bundles_post_ra>
